<compile_context>
chip_gen: v7x
topology: tpu7x:2x2x1
jax: 0.10.0
libtpu: 0.0.40
codegen_flags: <defaults>
</compile_context>

<pallas_src>
import functools

import jax
import jax.numpy as jnp
import numpy as np
from jax import lax
from jax.experimental import pallas as pl
from jax.experimental.pallas import tpu as pltpu


# Packed-parameter row layout: all small vectors live in one VMEM block so each
# pass issues a single parameter DMA instead of ~13 tiny ones.
_ROW_W1 = 0        # rows 0-1 : W1   (BN-folded in passes B/C)
_ROW_B1 = 2        # row  2   : b1   (BN-folded in passes B/C)
_ROW_SCALARS = 3   # row  3   : [prelu_slope, c_g0, c_np, c_g1, 0...]
_ROW_AG = 8        # rows 8-15 : (W2 @ Wg @ Wgp)^T replicated x8
_ROW_ANP = 16      # rows 16-23: (W2 @ Wnp)^T replicated x8
_P_ROWS = 24

_NT = (((1,), (1,)), ((), ()))   # contract minor dims (a @ b.T)
_NN = (((1,), (0,)), ((), ()))   # standard matmul     (a @ b)


def _hidden(p_ref, x_ref):
    """PReLU(BN(x @ W1 + b1)); BN's affine is pre-folded into rows 0-2 of p_ref.

    The K=2 contraction is done as two VPU FMAs instead of an MXU matmul.
    """
    h = (x_ref[:, 0:1] * p_ref[_ROW_W1:_ROW_W1 + 1, :]
         + x_ref[:, 1:2] * p_ref[_ROW_W1 + 1:_ROW_W1 + 2, :]
         + p_ref[_ROW_B1:_ROW_B1 + 1, :])
    slope = p_ref[_ROW_SCALARS:_ROW_SCALARS + 1, 0:1]
    return jnp.where(h >= 0.0, h, slope * h)


def _bn_stats_kernel(p_ref, x_ref, stats_ref):
    """Pass A: accumulate sum(h) / sum(h*h) of h = x @ W1 + b1 over all N."""
    @pl.when(pl.program_id(0) == 0)
    def _():
        stats_ref[...] = jnp.zeros_like(stats_ref)

    h = (x_ref[:, 0:1] * p_ref[0:1, :]
         + x_ref[:, 1:2] * p_ref[1:2, :]
         + p_ref[2:3, :])
    stats_ref[0:1, :] += jnp.sum(h, axis=0, keepdims=True)
    stats_ref[1:2, :] += jnp.sum(h * h, axis=0, keepdims=True)


def _gather_kernel(p_ref, x_ref, vis_ref, gt_ref):
    """Pass B: accumulate Gt = [z | 1 | 0..]^T @ vn  -> shape [8, Dv].

    z = out_mlp @ (Wg @ Wgp) with the Linear(32,32)'s folded into rows 8-15 of
    p_ref; vn = row-normalized visual features.  This factorizes away the NxN
    cosine-similarity adjacency entirely.
    """
    @pl.when(pl.program_id(0) == 0)
    def _():
        gt_ref[...] = jnp.zeros_like(gt_ref)

    h2 = _hidden(p_ref, x_ref)                                     # [tn, 32] f32

    # z in row orientation: every row of p_ref[8:16] equals (W2 @ Wg @ Wgp)^T.
    zrow = lax.dot_general(p_ref[_ROW_AG:_ROW_AG + 8, :], h2, _NT,
                           preferred_element_type=jnp.float32)     # [8, tn]
    zrow = zrow + p_ref[_ROW_SCALARS:_ROW_SCALARS + 1, 1:2]        # + b2@Wg@Wgp
    r = lax.broadcasted_iota(jnp.int32, zrow.shape, 0)
    rhs = jnp.where(r == 0, zrow, jnp.where(r == 1, 1.0, 0.0))     # rows: z, 1, 0..

    v = vis_ref[...].astype(jnp.float32)
    vn = v * lax.rsqrt(jnp.sum(v * v, axis=-1, keepdims=True) + 1e-8)

    # bf16 MXU operands, f32 accumulation (elementwise work above stays f32).
    gt_ref[...] += lax.dot_general(rhs.astype(jnp.bfloat16),
                                   vn.astype(jnp.bfloat16), _NN,
                                   preferred_element_type=jnp.float32)  # [8, Dv]


def _scores_kernel(p_ref, x_ref, vis_ref, gt_ref, out_ref):
    """Pass C: per-node scores, written lane-dense as a (1, tile_n) row."""
    h2 = _hidden(p_ref, x_ref)                                     # [tn, 32]

    # node_projection (with input_mlp's second Linear folded in) -> [1, tn].
    nodes = lax.dot_general(p_ref[_ROW_ANP:_ROW_ANP + 8, :], h2, _NT,
                            preferred_element_type=jnp.float32)[0:1, :]
    nodes = nodes + p_ref[_ROW_SCALARS:_ROW_SCALARS + 1, 2:3]      # + b2@Wnp + bnp

    v = vis_ref[...].astype(jnp.float32)
    vn = (v * lax.rsqrt(jnp.sum(v * v, axis=-1, keepdims=True) + 1e-8)
          ).astype(jnp.bfloat16)
    nd = lax.dot_general(gt_ref[...].astype(jnp.bfloat16), vn, _NT,
                         preferred_element_type=jnp.float32)       # [8, tn]
    # Row 0 = adjacency-weighted numerator, row 1 = degree (adjacency row-sum).
    # NOTE: degree is kept unclamped to match the reference math; it is
    # guaranteed positive for non-negative (post-ReLU) visual features.
    gcn = nd[0:1, :] * pl.reciprocal(nd[1:2, :], approx=True)
    gcn = gcn + p_ref[_ROW_SCALARS:_ROW_SCALARS + 1, 3:4]          # + bg@Wgp + bgp

    out_ref[...] = nodes + gcn


@functools.partial(jax.jit, static_argnames=("tile_n",))
def linear_body_forward(x, visual, params, *, tile_n=512):
    """Linear_Body forward.  x: [N, 2] node features, visual: [N, Dv]."""
    n, dv = visual.shape
    tile_n = min(tile_n, n)
    if n % tile_n != 0 or tile_n % 8 != 0:
        raise ValueError("N must be a multiple of tile_n, and tile_n of 8.")
    num_tiles = n // tile_n

    # Budgeted for v7x's smaller VMEM so one tile_n config is portable.
    vmem_limit = 32 * 1024 * 1024
    f32 = jnp.float32

    w1, b1 = params["w1"], params["b1"]
    w2, b2 = params["w2"], params["b2"]
    wnp, bnp = params["wnp"], params["bnp"]
    wg, bg = params["wg"], params["bg"]
    wgp, bgp = params["wgp"], params["bgp"]

    # ---- Pass A: BatchNorm batch statistics (exact, global over N) ---------
    p1 = jnp.concatenate([w1, b1, jnp.zeros((5, 32), f32)], axis=0)   # (8, 32)
    stats = pl.pallas_call(
        _bn_stats_kernel,
        out_shape=jax.ShapeDtypeStruct((8, 32), f32),
        grid=(num_tiles,),
        in_specs=[pl.BlockSpec((8, 32), lambda i: (0, 0)),
                  pl.BlockSpec((tile_n, 2), lambda i: (i, 0))],
        out_specs=pl.BlockSpec((8, 32), lambda i: (0, 0)),
        compiler_params=pltpu.CompilerParams(
            dimension_semantics=("arbitrary",)),
    )(p1, x)

    # ---- Fold BN + all trailing Linear layers into a few small vectors -----
    mean = stats[0:1, :] / n
    var = stats[1:2, :] / n - mean * mean            # biased var (training-mode BN)
    bn_scale = params["gamma"] * lax.rsqrt(var + 1e-5)
    bn_shift = params["beta"] - mean * bn_scale
    w1f = w1 * bn_scale                              # BN folded into Linear(2, 32)
    b1f = b1 * bn_scale + bn_shift
    a_g = w2 @ wg @ wgp                              # [32, 1]
    a_np = w2 @ wnp                                  # [32, 1]
    c_g0 = (b2 @ wg @ wgp)[0, 0]
    c_np = (b2 @ wnp)[0, 0] + bnp[0, 0]
    c_g1 = (bg @ wgp)[0, 0] + bgp[0, 0]
    scalars = jnp.stack([params["prelu"][0, 0], c_g0, c_np, c_g1]).reshape(1, 4)
    p2 = jnp.concatenate([
        w1f, b1f,
        jnp.concatenate([scalars, jnp.zeros((1, 28), f32)], axis=1),
        jnp.zeros((4, 32), f32),
        jnp.tile(a_g.T, (8, 1)),
        jnp.tile(a_np.T, (8, 1)),
    ], axis=0)                                       # (_P_ROWS, 32)

    # ---- Pass B: Gt = [z | 1]^T @ vn  (graph-level reduction, [8, Dv]) ------
    gt = pl.pallas_call(
        _gather_kernel,
        out_shape=jax.ShapeDtypeStruct((8, dv), f32),
        grid=(num_tiles,),
        in_specs=[pl.BlockSpec((_P_ROWS, 32), lambda i: (0, 0)),
                  pl.BlockSpec((tile_n, 2), lambda i: (i, 0)),
                  pl.BlockSpec((tile_n, dv), lambda i: (i, 0))],
        out_specs=pl.BlockSpec((8, dv), lambda i: (0, 0)),
        compiler_params=pltpu.CompilerParams(
            dimension_semantics=("arbitrary",),
            vmem_limit_bytes=vmem_limit),
    )(p2, x, visual)

    # ---- Pass C: per-node scores, lane-dense (1, N) output ------------------
    scores = pl.pallas_call(
        _scores_kernel,
        out_shape=jax.ShapeDtypeStruct((1, n), f32),
        grid=(num_tiles,),
        in_specs=[pl.BlockSpec((_P_ROWS, 32), lambda i: (0, 0)),
                  pl.BlockSpec((tile_n, 2), lambda i: (i, 0)),
                  pl.BlockSpec((tile_n, dv), lambda i: (i, 0)),
                  pl.BlockSpec((8, dv), lambda i: (0, 0))],
        out_specs=pl.BlockSpec((1, tile_n), lambda i: (0, i)),
        compiler_params=pltpu.CompilerParams(
            dimension_semantics=("parallel",),
            vmem_limit_bytes=vmem_limit),
    )(p2, x, visual, gt)

    return scores.reshape(n)                         # .squeeze() -> [N]


def init_params(key):
    """Deterministic synthetic parameters (shapes from Linear_Body.__init__)."""
    ks = jax.random.split(key, 8)

    def linear(k, fin, fout):
        kw, kb = jax.random.split(k)
        bound = 1.0 / np.sqrt(fin)
        w = jax.random.uniform(kw, (fin, fout), jnp.float32, -bound, bound)
        b = jax.random.uniform(kb, (1, fout), jnp.float32, -bound, bound)
        return w, b

    w1, b1 = linear(ks[0], 2, 32)     # input_mlp[0]: Linear(2, 32)
    w2, b2 = linear(ks[1], 32, 32)    # input_mlp[4]: Linear(32, 32)
    wnp, bnp = linear(ks[2], 32, 1)   # node_projection: Linear(32, 1)
    wg, bg = linear(ks[3], 32, 32)    # CMCosConv internal Linear(32, 32)
    wgp, bgp = linear(ks[4], 32, 1)   # gcn_projection_body: Linear(32, 1)
    gamma = 1.0 + 0.1 * jax.random.normal(ks[5], (1, 32), jnp.float32)
    beta = 0.1 * jax.random.normal(ks[6], (1, 32), jnp.float32)
    prelu = jnp.full((1, 1), 0.25, jnp.float32)  # PyTorch PReLU default slope
    return dict(w1=w1, b1=b1, gamma=gamma, beta=beta, prelu=prelu,
                w2=w2, b2=b2, wnp=wnp, bnp=bnp, wg=wg, bg=bg, wgp=wgp, bgp=bgp)


def reference_forward(x, visual, p):
    """Pure-JAX f32 reference with the original (un-factorized) formulation."""
    h = x @ p["w1"] + p["b1"]
    mean = jnp.mean(h, axis=0, keepdims=True)
    var = jnp.mean((h - mean) ** 2, axis=0, keepdims=True)
    h = (h - mean) / jnp.sqrt(var + 1e-5) * p["gamma"] + p["beta"]
    h = jnp.where(h >= 0.0, h, p["prelu"] * h)
    out_mlp = h @ p["w2"] + p["b2"]
    nodes_scores = out_mlp @ p["wnp"] + p["bnp"]
    # TODO(synk): CMCosConv is defined outside this module; modeled here (and in
    # the kernel) as row-normalized cosine-similarity message passing + Linear(32,32).
    vn = visual / jnp.sqrt(jnp.sum(visual * visual, axis=-1, keepdims=True) + 1e-8)
    adj = vn @ vn.T
    adj = adj / jnp.sum(adj, axis=-1, keepdims=True)
    gcn_x = (adj @ out_mlp) @ p["wg"] + p["bg"]
    gcn_scores = gcn_x @ p["wgp"] + p["bgp"]
    return (nodes_scores + gcn_scores)[:, 0]


if __name__ == "__main__":
    key = jax.random.PRNGKey(0)
    k_x, k_v, k_p = jax.random.split(key, 3)

    N = 256          # number of graph nodes in the batch (small demo size)
    VISUAL_DIM = 256 # small stand-in for visual_dim=2048
    TILE_N = 128     # rows of x / visual per grid step

    x = jax.random.normal(k_x, (N, 2), jnp.float32)            # batch_graph_body.x
    # CNN-style (post-ReLU, non-negative) visual features -> well-conditioned degrees.
    visual = jax.nn.relu(jax.random.normal(k_v, (N, VISUAL_DIM), jnp.float32))
    params = init_params(k_p)

    out = linear_body_forward(x, visual, params, tile_n=TILE_N)
    out = jax.block_until_ready(out)

    ref = reference_forward(x, visual, params)
    # Tolerance relaxed vs. pure-f32: the Dv-wide matmuls use bf16 operands
    # (f32 accumulate) and the degree reciprocal uses the EUP approximation.
    np.testing.assert_allclose(np.asarray(out), np.asarray(ref), rtol=1e-2, atol=1e-2)
    assert out.shape == (N,)

    print("KERNEL_OK")
</pallas_src>

<mosaic_0001>
module attributes {stable_mosaic.version = 11 : i64} {
  func.func @_bn_stats_kernel(%arg0: i32, %arg1: memref<8x32xf32, #tpu.memory_space<vmem>>, %arg2: memref<128x2xf32, #tpu.memory_space<vmem>>, %arg3: memref<8x32xf32, #tpu.memory_space<vmem>>) attributes {dimension_semantics = [#tpu.dimension_semantics<arbitrary>], iteration_bounds = array<i64: 2>, scalar_prefetch = 0 : i64, scratch_operands = 0 : i64, tpu.core_type = #tpu.core_type<tc>, window_params = [{pipeline_mode = #tpu.pipeline_mode<synchronous>, transform_indices = @transform_0, window_bounds = array<i64: 8, 32>}, {transform_indices = @transform_1, window_bounds = array<i64: 128, 2>}, {pipeline_mode = #tpu.pipeline_mode<synchronous>, transform_indices = @transform_2, window_bounds = array<i64: 8, 32>}]} {
    %c0_i32 = arith.constant 0 : i32
    %0 = arith.cmpi eq, %arg0, %c0_i32 : i32
    %1 = arith.extui %0 : i1 to i32
    %c0_i32_0 = arith.constant 0 : i32
    %2 = arith.cmpi ne, %1, %c0_i32_0 : i32
    scf.if %2 {
      %cst_17 = arith.constant 0.000000e+00 : f32
      %28 = vector.broadcast %cst_17 : f32 to vector<8x32xf32>
      %c0_18 = arith.constant 0 : index
      %c0_19 = arith.constant 0 : index
      %29 = vector.load %arg3[%c0_18, %c0_19] : memref<8x32xf32, #tpu.memory_space<vmem>>, vector<8x32xf32>
      tpu.vector_store %arg3[%c0_18, %c0_19], %28 {strides = array<i32>} : memref<8x32xf32, #tpu.memory_space<vmem>>, vector<8x32xf32>,
    } else {
    }
    %c0 = arith.constant 0 : index
    %c0_1 = arith.constant 0 : index
    %3 = vector.load %arg2[%c0, %c0_1] : memref<128x2xf32, #tpu.memory_space<vmem>>, vector<128x1xf32>
    %c0_2 = arith.constant 0 : index
    %c0_3 = arith.constant 0 : index
    %4 = vector.load %arg1[%c0_2, %c0_3] : memref<8x32xf32, #tpu.memory_space<vmem>>, vector<1x32xf32>
    %5 = vector.broadcast %3 : vector<128x1xf32> to vector<128x32xf32>
    %6 = vector.broadcast %4 : vector<1x32xf32> to vector<128x32xf32>
    %7 = arith.mulf %5, %6 : vector<128x32xf32>
    %c0_4 = arith.constant 0 : index
    %c1 = arith.constant 1 : index
    %8 = vector.load %arg2[%c0_4, %c1] : memref<128x2xf32, #tpu.memory_space<vmem>>, vector<128x1xf32>
    %c1_5 = arith.constant 1 : index
    %c0_6 = arith.constant 0 : index
    %9 = vector.load %arg1[%c1_5, %c0_6] : memref<8x32xf32, #tpu.memory_space<vmem>>, vector<1x32xf32>
    %10 = vector.broadcast %8 : vector<128x1xf32> to vector<128x32xf32>
    %11 = vector.broadcast %9 : vector<1x32xf32> to vector<128x32xf32>
    %12 = arith.mulf %10, %11 : vector<128x32xf32>
    %13 = arith.addf %7, %12 : vector<128x32xf32>
    %c2 = arith.constant 2 : index
    %c0_7 = arith.constant 0 : index
    %14 = vector.load %arg1[%c2, %c0_7] : memref<8x32xf32, #tpu.memory_space<vmem>>, vector<1x32xf32>
    %15 = vector.broadcast %14 : vector<1x32xf32> to vector<128x32xf32>
    %16 = arith.addf %13, %15 : vector<128x32xf32>
    %c0_8 = arith.constant 0 : index
    %c0_9 = arith.constant 0 : index
    %17 = vector.load %arg3[%c0_8, %c0_9] : memref<8x32xf32, #tpu.memory_space<vmem>>, vector<1x32xf32>
    %cst = arith.constant dense<0.000000e+00> : vector<32xf32>
    %18 = vector.multi_reduction <add>, %16, %cst [0] : vector<128x32xf32> to vector<32xf32>
    %19 = vector.shape_cast %18 : vector<32xf32> to vector<1x32xf32>
    %20 = arith.addf %17, %19 : vector<1x32xf32>
    %c0_10 = arith.constant 0 : index
    %c0_11 = arith.constant 0 : index
    %21 = vector.load %arg3[%c0_10, %c0_11] : memref<8x32xf32, #tpu.memory_space<vmem>>, vector<1x32xf32>
    tpu.vector_store %arg3[%c0_10, %c0_11], %20 {strides = array<i32>} : memref<8x32xf32, #tpu.memory_space<vmem>>, vector<1x32xf32>,
    %c1_12 = arith.constant 1 : index
    %c0_13 = arith.constant 0 : index
    %22 = vector.load %arg3[%c1_12, %c0_13] : memref<8x32xf32, #tpu.memory_space<vmem>>, vector<1x32xf32>
    %23 = arith.mulf %16, %16 : vector<128x32xf32>
    %cst_14 = arith.constant dense<0.000000e+00> : vector<32xf32>
    %24 = vector.multi_reduction <add>, %23, %cst_14 [0] : vector<128x32xf32> to vector<32xf32>
    %25 = vector.shape_cast %24 : vector<32xf32> to vector<1x32xf32>
    %26 = arith.addf %22, %25 : vector<1x32xf32>
    %c1_15 = arith.constant 1 : index
    %c0_16 = arith.constant 0 : index
    %27 = vector.load %arg3[%c1_15, %c0_16] : memref<8x32xf32, #tpu.memory_space<vmem>>, vector<1x32xf32>
    tpu.vector_store %arg3[%c1_15, %c0_16], %26 {strides = array<i32>} : memref<8x32xf32, #tpu.memory_space<vmem>>, vector<1x32xf32>,
    return
  }
  func.func @transform_0(%arg0: i32) -> (i32, i32) {
    %c0_i32 = arith.constant 0 : i32
    %c0_i32_0 = arith.constant 0 : i32
    %c0_i32_1 = arith.constant 0 : i32
    return %c0_i32, %c0_i32_0 : i32, i32
  }
  func.func @transform_1(%arg0: i32) -> (i32, i32) {
    %c0_i32 = arith.constant 0 : i32
    %c0_i32_0 = arith.constant 0 : i32
    return %arg0, %c0_i32 : i32, i32
  }
  func.func @transform_2(%arg0: i32) -> (i32, i32) {
    %c0_i32 = arith.constant 0 : i32
    %c0_i32_0 = arith.constant 0 : i32
    %c0_i32_1 = arith.constant 0 : i32
    return %c0_i32, %c0_i32_0 : i32, i32
  }
}

module attributes {stable_mosaic.version = 11 : i64} {
  func.func @_scores_kernel(%arg0: i32, %arg1: memref<24x32xf32, #tpu.memory_space<vmem>>, %arg2: memref<128x2xf32, #tpu.memory_space<vmem>>, %arg3: memref<128x256xf32, #tpu.memory_space<vmem>>, %arg4: memref<8x256xf32, #tpu.memory_space<vmem>>, %arg5: memref<1x128xf32, #tpu.memory_space<vmem>>) attributes {dimension_semantics = [#tpu.dimension_semantics<parallel>], iteration_bounds = array<i64: 2>, scalar_prefetch = 0 : i64, scratch_operands = 0 : i64, tpu.core_type = #tpu.core_type<tc>, window_params = [{pipeline_mode = #tpu.pipeline_mode<synchronous>, transform_indices = @transform_0, window_bounds = array<i64: 24, 32>}, {transform_indices = @transform_1, window_bounds = array<i64: 128, 2>}, {transform_indices = @transform_2, window_bounds = array<i64: 128, 256>}, {pipeline_mode = #tpu.pipeline_mode<synchronous>, transform_indices = @transform_3, window_bounds = array<i64: 8, 256>}, {transform_indices = @transform_4, window_bounds = array<i64: 1, 128>}]} {
    %c0 = arith.constant 0 : index
    %c0_0 = arith.constant 0 : index
    %0 = vector.load %arg2[%c0, %c0_0] : memref<128x2xf32, #tpu.memory_space<vmem>>, vector<128x1xf32>
    %c0_1 = arith.constant 0 : index
    %c0_2 = arith.constant 0 : index
    %1 = vector.load %arg1[%c0_1, %c0_2] : memref<24x32xf32, #tpu.memory_space<vmem>>, vector<1x32xf32>
    %2 = vector.broadcast %0 : vector<128x1xf32> to vector<128x32xf32>
    %3 = vector.broadcast %1 : vector<1x32xf32> to vector<128x32xf32>
    %4 = arith.mulf %2, %3 : vector<128x32xf32>
    %c0_3 = arith.constant 0 : index
    %c1 = arith.constant 1 : index
    %5 = vector.load %arg2[%c0_3, %c1] : memref<128x2xf32, #tpu.memory_space<vmem>>, vector<128x1xf32>
    %c1_4 = arith.constant 1 : index
    %c0_5 = arith.constant 0 : index
    %6 = vector.load %arg1[%c1_4, %c0_5] : memref<24x32xf32, #tpu.memory_space<vmem>>, vector<1x32xf32>
    %7 = vector.broadcast %5 : vector<128x1xf32> to vector<128x32xf32>
    %8 = vector.broadcast %6 : vector<1x32xf32> to vector<128x32xf32>
    %9 = arith.mulf %7, %8 : vector<128x32xf32>
    %10 = arith.addf %4, %9 : vector<128x32xf32>
    %c2 = arith.constant 2 : index
    %c0_6 = arith.constant 0 : index
    %11 = vector.load %arg1[%c2, %c0_6] : memref<24x32xf32, #tpu.memory_space<vmem>>, vector<1x32xf32>
    %12 = vector.broadcast %11 : vector<1x32xf32> to vector<128x32xf32>
    %13 = arith.addf %10, %12 : vector<128x32xf32>
    %c3 = arith.constant 3 : index
    %c0_7 = arith.constant 0 : index
    %14 = vector.load %arg1[%c3, %c0_7] : memref<24x32xf32, #tpu.memory_space<vmem>>, vector<1x1xf32>
    %cst = arith.constant 0.000000e+00 : f32
    %15 = vector.broadcast %cst : f32 to vector<128x32xf32>
    %16 = arith.cmpf oge, %13, %15 : vector<128x32xf32>
    %17 = vector.broadcast %14 : vector<1x1xf32> to vector<128x32xf32>
    %18 = arith.mulf %17, %13 : vector<128x32xf32>
    %19 = arith.select %16, %13, %18 : vector<128x32xi1>, vector<128x32xf32>
    %c16 = arith.constant 16 : index
    %c0_8 = arith.constant 0 : index
    %20 = vector.load %arg1[%c16, %c0_8] : memref<24x32xf32, #tpu.memory_space<vmem>>, vector<8x32xf32>
    %cst_9 = arith.constant dense<0.000000e+00> : vector<8x128xf32>
    %21 = tpu.matmul %20, %19, %cst_9 {dimension_numbers = #tpu.dot_dimension_numbers<[1], [1], [0], [0], [0, 0, 1, 0], [], []>} : vector<8x32xf32>, vector<128x32xf32>, vector<8x128xf32> -> vector<8x128xf32>
    %22 = vector.extract_strided_slice %21 {offsets = [0, 0], sizes = [1, 128], strides = [1, 1]} : vector<8x128xf32> to vector<1x128xf32>
    %c3_10 = arith.constant 3 : index
    %c2_11 = arith.constant 2 : index
    %23 = vector.load %arg1[%c3_10, %c2_11] : memref<24x32xf32, #tpu.memory_space<vmem>>, vector<1x1xf32>
    %24 = vector.broadcast %23 : vector<1x1xf32> to vector<1x128xf32>
    %25 = arith.addf %22, %24 : vector<1x128xf32>
    %c0_12 = arith.constant 0 : index
    %c0_13 = arith.constant 0 : index
    %26 = vector.load %arg3[%c0_12, %c0_13] : memref<128x256xf32, #tpu.memory_space<vmem>>, vector<128x256xf32>
    %27 = arith.mulf %26, %26 : vector<128x256xf32>
    %cst_14 = arith.constant dense<0.000000e+00> : vector<128xf32>
    %28 = vector.multi_reduction <add>, %27, %cst_14 [1] : vector<128x256xf32> to vector<128xf32>
    %29 = vector.shape_cast %28 : vector<128xf32> to vector<128x1xf32>
    %cst_15 = arith.constant 9.99999993E-9 : f32
    %30 = vector.broadcast %cst_15 : f32 to vector<128x1xf32>
    %31 = arith.addf %29, %30 : vector<128x1xf32>
    %32 = math.rsqrt %31 : vector<128x1xf32>
    %33 = vector.broadcast %32 : vector<128x1xf32> to vector<128x256xf32>
    %34 = arith.mulf %26, %33 : vector<128x256xf32>
    %35 = arith.truncf %34 : vector<128x256xf32> to vector<128x256xbf16>
    %c0_16 = arith.constant 0 : index
    %c0_17 = arith.constant 0 : index
    %36 = vector.load %arg4[%c0_16, %c0_17] : memref<8x256xf32, #tpu.memory_space<vmem>>, vector<8x256xf32>
    %37 = arith.truncf %36 : vector<8x256xf32> to vector<8x256xbf16>
    %cst_18 = arith.constant dense<0.000000e+00> : vector<8x128xf32>
    %38 = tpu.matmul %37, %35, %cst_18 {dimension_numbers = #tpu.dot_dimension_numbers<[1], [1], [0], [0], [0, 0, 1, 0], [], []>} : vector<8x256xbf16>, vector<128x256xbf16>, vector<8x128xf32> -> vector<8x128xf32>
    %39 = vector.extract_strided_slice %38 {offsets = [0, 0], sizes = [1, 128], strides = [1, 1]} : vector<8x128xf32> to vector<1x128xf32>
    %40 = vector.extract_strided_slice %38 {offsets = [1, 0], sizes = [1, 128], strides = [1, 1]} : vector<8x128xf32> to vector<1x128xf32>
    %41 = tpu.reciprocal %40 {approx = true} : vector<1x128xf32> -> vector<1x128xf32>
    %42 = arith.mulf %39, %41 : vector<1x128xf32>
    %c3_19 = arith.constant 3 : index
    %c3_20 = arith.constant 3 : index
    %43 = vector.load %arg1[%c3_19, %c3_20] : memref<24x32xf32, #tpu.memory_space<vmem>>, vector<1x1xf32>
    %44 = vector.broadcast %43 : vector<1x1xf32> to vector<1x128xf32>
    %45 = arith.addf %42, %44 : vector<1x128xf32>
    %46 = arith.addf %25, %45 : vector<1x128xf32>
    %c0_21 = arith.constant 0 : index
    %c0_22 = arith.constant 0 : index
    %47 = vector.load %arg5[%c0_21, %c0_22] : memref<1x128xf32, #tpu.memory_space<vmem>>, vector<1x128xf32>
    tpu.vector_store %arg5[%c0_21, %c0_22], %46 {strides = array<i32>} : memref<1x128xf32, #tpu.memory_space<vmem>>, vector<1x128xf32>,
    return
  }
  func.func @transform_0(%arg0: i32) -> (i32, i32) {
    %c0_i32 = arith.constant 0 : i32
    %c0_i32_0 = arith.constant 0 : i32
    %c0_i32_1 = arith.constant 0 : i32
    return %c0_i32, %c0_i32_0 : i32, i32
  }
  func.func @transform_1(%arg0: i32) -> (i32, i32) {
    %c0_i32 = arith.constant 0 : i32
    %c0_i32_0 = arith.constant 0 : i32
    return %arg0, %c0_i32 : i32, i32
  }
  func.func @transform_2(%arg0: i32) -> (i32, i32) {
    %c0_i32 = arith.constant 0 : i32
    %c0_i32_0 = arith.constant 0 : i32
    return %arg0, %c0_i32 : i32, i32
  }
  func.func @transform_3(%arg0: i32) -> (i32, i32) {
    %c0_i32 = arith.constant 0 : i32
    %c0_i32_0 = arith.constant 0 : i32
    %c0_i32_1 = arith.constant 0 : i32
    return %c0_i32, %c0_i32_0 : i32, i32
  }
  func.func @transform_4(%arg0: i32) -> (i32, i32) {
    %c0_i32 = arith.constant 0 : i32
    %c0_i32_0 = arith.constant 0 : i32
    return %c0_i32, %arg0 : i32, i32
  }
}

module attributes {stable_mosaic.version = 11 : i64} {
  func.func @_gather_kernel(%arg0: i32, %arg1: memref<24x32xf32, #tpu.memory_space<vmem>>, %arg2: memref<128x2xf32, #tpu.memory_space<vmem>>, %arg3: memref<128x256xf32, #tpu.memory_space<vmem>>, %arg4: memref<8x256xf32, #tpu.memory_space<vmem>>) attributes {dimension_semantics = [#tpu.dimension_semantics<arbitrary>], iteration_bounds = array<i64: 2>, scalar_prefetch = 0 : i64, scratch_operands = 0 : i64, tpu.core_type = #tpu.core_type<tc>, window_params = [{pipeline_mode = #tpu.pipeline_mode<synchronous>, transform_indices = @transform_0, window_bounds = array<i64: 24, 32>}, {transform_indices = @transform_1, window_bounds = array<i64: 128, 2>}, {transform_indices = @transform_2, window_bounds = array<i64: 128, 256>}, {pipeline_mode = #tpu.pipeline_mode<synchronous>, transform_indices = @transform_3, window_bounds = array<i64: 8, 256>}]} {
    %c0_i32 = arith.constant 0 : i32
    %0 = arith.cmpi eq, %arg0, %c0_i32 : i32
    %1 = arith.extui %0 : i1 to i32
    %c0_i32_0 = arith.constant 0 : i32
    %2 = arith.cmpi ne, %1, %c0_i32_0 : i32
    scf.if %2 {
      %cst_25 = arith.constant 0.000000e+00 : f32
      %52 = vector.broadcast %cst_25 : f32 to vector<8x256xf32>
      %c0_26 = arith.constant 0 : index
      %c0_27 = arith.constant 0 : index
      %53 = vector.load %arg4[%c0_26, %c0_27] : memref<8x256xf32, #tpu.memory_space<vmem>>, vector<8x256xf32>
      tpu.vector_store %arg4[%c0_26, %c0_27], %52 {strides = array<i32>} : memref<8x256xf32, #tpu.memory_space<vmem>>, vector<8x256xf32>,
    } else {
    }
    %c0 = arith.constant 0 : index
    %c0_1 = arith.constant 0 : index
    %3 = vector.load %arg2[%c0, %c0_1] : memref<128x2xf32, #tpu.memory_space<vmem>>, vector<128x1xf32>
    %c0_2 = arith.constant 0 : index
    %c0_3 = arith.constant 0 : index
    %4 = vector.load %arg1[%c0_2, %c0_3] : memref<24x32xf32, #tpu.memory_space<vmem>>, vector<1x32xf32>
    %5 = vector.broadcast %3 : vector<128x1xf32> to vector<128x32xf32>
    %6 = vector.broadcast %4 : vector<1x32xf32> to vector<128x32xf32>
    %7 = arith.mulf %5, %6 : vector<128x32xf32>
    %c0_4 = arith.constant 0 : index
    %c1 = arith.constant 1 : index
    %8 = vector.load %arg2[%c0_4, %c1] : memref<128x2xf32, #tpu.memory_space<vmem>>, vector<128x1xf32>
    %c1_5 = arith.constant 1 : index
    %c0_6 = arith.constant 0 : index
    %9 = vector.load %arg1[%c1_5, %c0_6] : memref<24x32xf32, #tpu.memory_space<vmem>>, vector<1x32xf32>
    %10 = vector.broadcast %8 : vector<128x1xf32> to vector<128x32xf32>
    %11 = vector.broadcast %9 : vector<1x32xf32> to vector<128x32xf32>
    %12 = arith.mulf %10, %11 : vector<128x32xf32>
    %13 = arith.addf %7, %12 : vector<128x32xf32>
    %c2 = arith.constant 2 : index
    %c0_7 = arith.constant 0 : index
    %14 = vector.load %arg1[%c2, %c0_7] : memref<24x32xf32, #tpu.memory_space<vmem>>, vector<1x32xf32>
    %15 = vector.broadcast %14 : vector<1x32xf32> to vector<128x32xf32>
    %16 = arith.addf %13, %15 : vector<128x32xf32>
    %c3 = arith.constant 3 : index
    %c0_8 = arith.constant 0 : index
    %17 = vector.load %arg1[%c3, %c0_8] : memref<24x32xf32, #tpu.memory_space<vmem>>, vector<1x1xf32>
    %cst = arith.constant 0.000000e+00 : f32
    %18 = vector.broadcast %cst : f32 to vector<128x32xf32>
    %19 = arith.cmpf oge, %16, %18 : vector<128x32xf32>
    %20 = vector.broadcast %17 : vector<1x1xf32> to vector<128x32xf32>
    %21 = arith.mulf %20, %16 : vector<128x32xf32>
    %22 = arith.select %19, %16, %21 : vector<128x32xi1>, vector<128x32xf32>
    %c8 = arith.constant 8 : index
    %c0_9 = arith.constant 0 : index
    %23 = vector.load %arg1[%c8, %c0_9] : memref<24x32xf32, #tpu.memory_space<vmem>>, vector<8x32xf32>
    %cst_10 = arith.constant dense<0.000000e+00> : vector<8x128xf32>
    %24 = tpu.matmul %23, %22, %cst_10 {dimension_numbers = #tpu.dot_dimension_numbers<[1], [1], [0], [0], [0, 0, 1, 0], [], []>} : vector<8x32xf32>, vector<128x32xf32>, vector<8x128xf32> -> vector<8x128xf32>
    %c3_11 = arith.constant 3 : index
    %c1_12 = arith.constant 1 : index
    %25 = vector.load %arg1[%c3_11, %c1_12] : memref<24x32xf32, #tpu.memory_space<vmem>>, vector<1x1xf32>
    %26 = vector.broadcast %25 : vector<1x1xf32> to vector<8x128xf32>
    %27 = arith.addf %24, %26 : vector<8x128xf32>
    %28 = tpu.iota {dimensions = array<i32: 0>} : vector<8x128xi32>
    %c0_i32_13 = arith.constant 0 : i32
    %29 = vector.broadcast %c0_i32_13 : i32 to vector<8x128xi32>
    %30 = arith.cmpi eq, %28, %29 : vector<8x128xi32>
    %c1_i32 = arith.constant 1 : i32
    %31 = vector.broadcast %c1_i32 : i32 to vector<8x128xi32>
    %32 = arith.cmpi eq, %28, %31 : vector<8x128xi32>
    %cst_14 = arith.constant 1.000000e+00 : f32
    %cst_15 = arith.constant 0.000000e+00 : f32
    %33 = vector.broadcast %cst_14 : f32 to vector<8x128xf32>
    %34 = vector.broadcast %cst_15 : f32 to vector<8x128xf32>
    %35 = arith.select %32, %33, %34 : vector<8x128xi1>, vector<8x128xf32>
    %36 = arith.select %30, %27, %35 : vector<8x128xi1>, vector<8x128xf32>
    %c0_16 = arith.constant 0 : index
    %c0_17 = arith.constant 0 : index
    %37 = vector.load %arg3[%c0_16, %c0_17] : memref<128x256xf32, #tpu.memory_space<vmem>>, vector<128x256xf32>
    %38 = arith.mulf %37, %37 : vector<128x256xf32>
    %cst_18 = arith.constant dense<0.000000e+00> : vector<128xf32>
    %39 = vector.multi_reduction <add>, %38, %cst_18 [1] : vector<128x256xf32> to vector<128xf32>
    %40 = vector.shape_cast %39 : vector<128xf32> to vector<128x1xf32>
    %cst_19 = arith.constant 9.99999993E-9 : f32
    %41 = vector.broadcast %cst_19 : f32 to vector<128x1xf32>
    %42 = arith.addf %40, %41 : vector<128x1xf32>
    %43 = math.rsqrt %42 : vector<128x1xf32>
    %44 = vector.broadcast %43 : vector<128x1xf32> to vector<128x256xf32>
    %45 = arith.mulf %37, %44 : vector<128x256xf32>
    %c0_20 = arith.constant 0 : index
    %c0_21 = arith.constant 0 : index
    %46 = vector.load %arg4[%c0_20, %c0_21] : memref<8x256xf32, #tpu.memory_space<vmem>>, vector<8x256xf32>
    %47 = arith.truncf %36 : vector<8x128xf32> to vector<8x128xbf16>
    %48 = arith.truncf %45 : vector<128x256xf32> to vector<128x256xbf16>
    %cst_22 = arith.constant dense<0.000000e+00> : vector<8x256xf32>
    %49 = tpu.matmul %47, %48, %cst_22 {dimension_numbers = #tpu.dot_dimension_numbers<[1], [0], [0], [1], [0, 0, 1, 1], [], []>} : vector<8x128xbf16>, vector<128x256xbf16>, vector<8x256xf32> -> vector<8x256xf32>
    %50 = arith.addf %46, %49 : vector<8x256xf32>
    %c0_23 = arith.constant 0 : index
    %c0_24 = arith.constant 0 : index
    %51 = vector.load %arg4[%c0_23, %c0_24] : memref<8x256xf32, #tpu.memory_space<vmem>>, vector<8x256xf32>
    tpu.vector_store %arg4[%c0_23, %c0_24], %50 {strides = array<i32>} : memref<8x256xf32, #tpu.memory_space<vmem>>, vector<8x256xf32>,
    return
  }
  func.func @transform_0(%arg0: i32) -> (i32, i32) {
    %c0_i32 = arith.constant 0 : i32
    %c0_i32_0 = arith.constant 0 : i32
    %c0_i32_1 = arith.constant 0 : i32
    return %c0_i32, %c0_i32_0 : i32, i32
  }
  func.func @transform_1(%arg0: i32) -> (i32, i32) {
    %c0_i32 = arith.constant 0 : i32
    %c0_i32_0 = arith.constant 0 : i32
    return %arg0, %c0_i32 : i32, i32
  }
  func.func @transform_2(%arg0: i32) -> (i32, i32) {
    %c0_i32 = arith.constant 0 : i32
    %c0_i32_0 = arith.constant 0 : i32
    return %arg0, %c0_i32 : i32, i32
  }
  func.func @transform_3(%arg0: i32) -> (i32, i32) {
    %c0_i32 = arith.constant 0 : i32
    %c0_i32_0 = arith.constant 0 : i32
    %c0_i32_1 = arith.constant 0 : i32
    return %c0_i32, %c0_i32_0 : i32, i32
  }
}

</mosaic_0001>

<bundles_post_ra>
// kernel: linear_body_forward.3
= control target key start
LH: loop header
LB: loop body
LE: loop exit
PB: predicated region body
PF: predicated region fallthrough
CT: control target
= control target key end

     0   :  { %s556_s9 = smov 0   ;;  %s698_s0 = inlined_call_operand.vmem [shape: f32[8,32], index: 0, kind: input, shape index: {}]   ;;  %s699_s1 = inlined_call_operand.vmem [shape: f32[256,2], index: 1, kind: input, shape index: {}]   ;;  %s700_s2 = inlined_call_operand.vmem [shape: f32[8,32], index: 2, kind: output, shape index: {}]  }
   0x1 LB: > { %s502_s10 = sadd.s32 4294967295, %s536_s9   ;;  %p505_p0 = scmp.ge.s32.totalorder %s536_s9, 1  ;;  %s536_s9 = sphi %s556_s9, %s12_s9  }
   0x2   : > { %p108_p1 = scmp.lt.s32.totalorder %s536_s9, 3 }
   0x4   : > { %p109_p2 = pnand %p505_p0, %p108_p1 }
   0x5   : > { %s506_s11 = sshll.u32 (!%p109_p2), %s502_s10, 4  ;;  %p508_p4 = scmp.ne.s32.totalorder (!%p109_p2), %s502_s10, 0 }
   0x6   : > { %112 = sbr.rel (%p109_p2) target bundleno = 238 (0xee), region = 28  ;;  %p126_p3 = scmp.lt.s32.totalorder (!%p109_p2), %s506_s11, 31 }
   0xd   : > { %s702_s11 = smov (!%p126_p3, %s506_s11), 31  ;;  %134 = sbr.rel (%p508_p4) target bundleno = 20 (0x14), region = 32 }
   0xe   : > { %s507_s12 = sshll.u32 %s702_s11, 3  ;;  %vm135_vm0 = vcmask (!%p508_p4), 261120   ;;  %v538_v0 = vmov (!%p508_p4), 0.0  }
   0xf   : > { %s567_s15 = scalar_lea.vmem %s699_s1, %s507_s12  ;;  %136 = vst.msk [vmem:[%s700_s2] sm:$0xff] (!%p508_p4), %vm135_vm0, %v538_v0 }
  0x14 PF: > { %v139_v1 = vld [vmem:[%s567_s15 + $0x10] sm:$0xff]  ;;  %v137_v2 = vld [vmem:[%s567_s15] sm:$0xff]  ;;  %v539_v3 = vmov 0   ;;  %v138_v4 = vld [vmem:[%s567_s15 + $0x8] sm:$0xff]  ;;  %v540_v5 = vmov 1   ;;  %vm377_vm1 = vcmask 261120  }
  0x15   : > { %526 = vset.pattern.permute.xlu1 %v539_v3  ;;  %525 = vset.pattern.permute.xlu0 %v539_v3  ;;  %v140_v6 = vld [vmem:[%s567_s15 + $0x18] sm:$0xff]  ;;  %v141_v7 = vld [vmem:[%s567_s15 + $0x20] sm:$0xff]  ;;  %v142_v8 = vld [vmem:[%s567_s15 + $0x28] sm:$0xff]  ;;  %vm416_vm2 = vcmask 253952  }
  0x16   : > { %166 = vperm.xlu1 %526, %v139_v1   ;;  %156 = vperm.xlu0 %525, %v137_v2   ;;  %v143_v9 = vld [vmem:[%s567_s15 + $0x30] sm:$0xff]  ;;  %v144_v10 = vld [vmem:[%s567_s15 + $0x38] sm:$0xff]  ;;  %v145_v11 = vld [vmem:[%s567_s15 + $0x40] sm:$0xff] }
  0x17   : > { %v146_v12 = vld [vmem:[%s567_s15 + $0x48] sm:$0xff]  ;;  %v147_v13 = vld [vmem:[%s567_s15 + $0x50] sm:$0xff]  ;;  %v148_v14 = vld [vmem:[%s567_s15 + $0x58] sm:$0xff] }
  0x18   : > { %v149_v15 = vld [vmem:[%s567_s15 + $0x60] sm:$0xff]  ;;  %v150_v16 = vld [vmem:[%s567_s15 + $0x68] sm:$0xff]  ;;  %v151_v17 = vld [vmem:[%s567_s15 + $0x70] sm:$0xff] }
  0x19   : > { %v152_v18 = vld [vmem:[%s567_s15 + $0x78] sm:$0xff]  ;;  %v591_v29 = vld [vmem:[%s698_s0 + $0x1] ss:$0 sm:$0xff]  ;;  %v597_v32 = vld [vmem:[%s698_s0] ss:$0 sm:$0xff] }
  0x1a   : > { %527 = vset.pattern.permute.xlu1 %v540_v5  ;;  %161 = vperm.xlu0 %525, %v138_v4   ;;  %v607_v43 = vld [vmem:[%s698_s0 + $0x2] ss:$0 sm:$0xff] }
  0x1b   : > { %256 = vperm.xlu1 %527, %v137_v2  }
  0x1e   : > { %528 = vset.pattern.permute.xlu0 %v540_v5 }
  0x1f   : > { %264 = vperm.xlu1 %527, %v139_v1   ;;  %260 = vperm.xlu0 %528, %v138_v4  }
  0x23   : > { %529 = vset.pattern.permute.xlu1 %v539_v3  ;;  %268 = vperm.xlu0 %528, %v140_v6  }
  0x24   : > { %171 = vperm.xlu1 %529, %v140_v6  }
  0x27   : > { %272 = vperm.xlu0 %528, %v141_v7  }
  0x28   : > { %176 = vperm.xlu1 %529, %v141_v7  }
  0x2b   : > { %276 = vperm.xlu0 %528, %v142_v8  }
  0x2c   : > { %181 = vperm.xlu1 %529, %v142_v8  }
  0x2f   : > { %280 = vperm.xlu0 %528, %v143_v9  }
  0x30   : > { %186 = vperm.xlu1 %529, %v143_v9  }
  0x33   : > { %284 = vperm.xlu0 %528, %v144_v10  }
  0x34   : > { %191 = vperm.xlu1 %529, %v144_v10  }
  0x37   : > { %288 = vperm.xlu0 %528, %v145_v11  }
  0x38   : > { %196 = vperm.xlu1 %529, %v145_v11  }
  0x3b   : > { %292 = vperm.xlu0 %528, %v146_v12  }
  0x3c   : > { %201 = vperm.xlu1 %529, %v146_v12  }
  0x3f   : > { %296 = vperm.xlu0 %528, %v147_v13  }
  0x40   : > { %206 = vperm.xlu1 %529, %v147_v13  }
  0x43   : > { %300 = vperm.xlu0 %528, %v148_v14  }
  0x44   : > { %211 = vperm.xlu1 %529, %v148_v14  }
  0x47   : > { %304 = vperm.xlu0 %528, %v149_v15  }
  0x48   : > { %216 = vperm.xlu1 %529, %v149_v15  }
  0x4b   : > { %308 = vperm.xlu0 %528, %v150_v16  }
  0x4c   : > { %221 = vperm.xlu1 %529, %v150_v16  }
  0x4f   : > { %312 = vperm.xlu0 %528, %v151_v17  }
  0x50   : > { %226 = vperm.xlu1 %529, %v151_v17  }
  0x53   : > { %316 = vperm.xlu0 %528, %v152_v18  }
  0x54   : > { %231 = vperm.xlu1 %529, %v152_v18  }
  0x95   : > { %v167_v19 = vpop.permute.xlu1 %166  ;;  %v157_v20 = vpop.permute.xlu0 %156 }
  0x96   : > { %v238_v36 = vmul.f32 %v597_v32, %v157_v20  ;;  %v240_v42 = vmul.f32 %v597_v32, %v167_v19 }
  0x99   : > { %v162_v21 = vpop.permute.xlu0 %161 }
  0x9a   : > { %v257_v22 = vpop.permute.xlu1 %256  ;;  %v239_v34 = vmul.f32 %v597_v32, %v162_v21 }
  0x9b   : > { %v323_v35 = vmul.f32 %v591_v29, %v257_v22 }
  0x9d   : > { %v339_v41 = vadd.f32 %v323_v35, %v238_v36 }
  0x9e   : > { %v265_v23 = vpop.permute.xlu1 %264  ;;  %v261_v24 = vpop.permute.xlu0 %260 }
  0x9f   : > { %v324_v30 = vmul.f32 %v591_v29, %v261_v24  ;;  %v325_v39 = vmul.f32 %v591_v29, %v265_v23  ;;  %v360_v52 = vadd.f32 %v607_v43, %v339_v41 }
  0xa1   : > { %v340_v37 = vadd.f32 %v324_v30, %v239_v34  ;;  %v341_v48 = vadd.f32 %v325_v39, %v240_v42  ;;  %v419_v61 = vmul.f32 %v360_v52, %v360_v52  ;;  %v378_v3 = vsel %vm377_vm1, %v360_v52, 0.0 }
  0xa2   : > { %v269_v25 = vpop.permute.xlu0 %268 }
  0xa3   : > { %v172_v26 = vpop.permute.xlu1 %171  ;;  %v361_v44 = vadd.f32 %v607_v43, %v340_v37  ;;  %v326_v45 = vmul.f32 %v591_v29, %v269_v25  ;;  %v362_v58 = vadd.f32 %v607_v43, %v341_v48  ;;  %v435_v12 = vsel %vm377_vm1, %v419_v61, 0.0 }
  0xa4   : > { %v241_v46 = vmul.f32 %v597_v32, %v172_v26 }
  0xa5   : > { %v420_v53 = vmul.f32 %v361_v44, %v361_v44  ;;  %v379_v62 = vsel %vm377_vm1, %v361_v44, 0.0  ;;  %v421_v8 = vmul.f32 %v362_v58, %v362_v58  ;;  %v381_v16 = vsel %vm377_vm1, %v362_v58, 0.0 }
  0xa6   : > { %v273_v27 = vpop.permute.xlu0 %272  ;;  %v342_v54 = vadd.f32 %v326_v45, %v241_v46  ;;  %v380_v9 = vadd.f32 %v379_v62, %v378_v3 }
  0xa7   : > { %v177_v28 = vpop.permute.xlu1 %176  ;;  %v327_v49 = vmul.f32 %v591_v29, %v273_v27  ;;  %v436_v4 = vsel %vm377_vm1, %v420_v53, 0.0  ;;  %v438_v24 = vsel %vm377_vm1, %v421_v8, 0.0 }
  0xa8   : > { %v242_v50 = vmul.f32 %v597_v32, %v177_v28  ;;  %v363_v5 = vadd.f32 %v607_v43, %v342_v54  ;;  %v437_v17 = vadd.f32 %v436_v4, %v435_v12  ;;  %v382_v25 = vadd.f32 %v381_v16, %v380_v9 }
  0xaa   : > { %v277_v31 = vpop.permute.xlu0 %276  ;;  %v343_v59 = vadd.f32 %v327_v49, %v242_v50  ;;  %v422_v19 = vmul.f32 %v363_v5, %v363_v5  ;;  %v383_v30 = vsel %vm377_vm1, %v363_v5, 0.0  ;;  %v439_v35 = vadd.f32 %v438_v24, %v437_v17 }
  0xab   : > { %v182_v33 = vpop.permute.xlu1 %181  ;;  %v328_v55 = vmul.f32 %v591_v29, %v277_v31  ;;  %v384_v42 = vadd.f32 %v383_v30, %v382_v25 }
  0xac   : > { %v243_v56 = vmul.f32 %v597_v32, %v182_v33  ;;  %v364_v10 = vadd.f32 %v607_v43, %v343_v59  ;;  %v440_v37 = vsel %vm377_vm1, %v422_v19, 0.0 }
  0xad   : > { %v441_v52 = vadd.f32 %v440_v37, %v439_v35 }
  0xae   : > { %v281_v38 = vpop.permute.xlu0 %280  ;;  %v344_v6 = vadd.f32 %v328_v55, %v243_v56  ;;  %v423_v26 = vmul.f32 %v364_v10, %v364_v10 }
  0xaf   : > { %v187_v40 = vpop.permute.xlu1 %186  ;;  %v329_v63 = vmul.f32 %v591_v29, %v281_v38  ;;  %v385_v38 = vsel %vm377_vm1, %v364_v10, 0.0 }
  0xb0   : > { %v244_v0 = vmul.f32 %v597_v32, %v187_v40  ;;  %v365_v20 = vadd.f32 %v607_v43, %v344_v6  ;;  %v442_v44 = vsel %vm377_vm1, %v423_v26, 0.0  ;;  %v386_v53 = vadd.f32 %v385_v38, %v384_v42 }
  0xb2   : > { %v285_v47 = vpop.permute.xlu0 %284  ;;  %v345_v13 = vadd.f32 %v329_v63, %v244_v0  ;;  %v424_v39 = vmul.f32 %v365_v20, %v365_v20  ;;  %v387_v48 = vsel %vm377_vm1, %v365_v20, 0.0 }
  0xb3   : > { %v192_v51 = vpop.permute.xlu1 %191  ;;  %v330_v1 = vmul.f32 %v591_v29, %v285_v47  ;;  %v388_v61 = vadd.f32 %v387_v48, %v386_v53 }
  0xb4   : > { %v245_v2 = vmul.f32 %v597_v32, %v192_v51  ;;  %v366_v31 = vadd.f32 %v607_v43, %v345_v13  ;;  %v444_v55 = vsel %vm377_vm1, %v424_v39, 0.0 }
  0xb6   : > { %v289_v57 = vpop.permute.xlu0 %288  ;;  %v346_v18 = vadd.f32 %v330_v1, %v245_v2  ;;  %v425_v49 = vmul.f32 %v366_v31, %v366_v31  ;;  %v389_v56 = vsel %vm377_vm1, %v366_v31, 0.0 }
  0xb7   : > { %v197_v60 = vpop.permute.xlu1 %196  ;;  %v331_v14 = vmul.f32 %v591_v29, %v289_v57  ;;  %v390_v6 = vadd.f32 %v389_v56, %v388_v61 }
  0xb8   : > { %v246_v15 = vmul.f32 %v597_v32, %v197_v60  ;;  %v367_v36 = vadd.f32 %v607_v43, %v346_v18  ;;  %v443_v60 = vadd.f32 %v442_v44, %v441_v52  ;;  %v446_v1 = vsel %vm377_vm1, %v425_v49, 0.0 }
  0xba   : > { %v293_v7 = vpop.permute.xlu0 %292  ;;  %v347_v33 = vadd.f32 %v331_v14, %v246_v15  ;;  %v426_v54 = vmul.f32 %v367_v36, %v367_v36  ;;  %v391_v2 = vsel %vm377_vm1, %v367_v36, 0.0  ;;  %v445_v5 = vadd.f32 %v444_v55, %v443_v60 }
  0xbb   : > { %v202_v11 = vpop.permute.xlu1 %201  ;;  %v332_v21 = vmul.f32 %v591_v29, %v293_v7  ;;  %v392_v14 = vadd.f32 %v391_v2, %v390_v6 }
  0xbc   : > { %v247_v22 = vmul.f32 %v597_v32, %v202_v11  ;;  %v368_v50 = vadd.f32 %v607_v43, %v347_v33  ;;  %v448_v7 = vsel %vm377_vm1, %v426_v54, 0.0  ;;  %v447_v13 = vadd.f32 %v446_v1, %v445_v5 }
  0xbe   : > { %v297_v23 = vpop.permute.xlu0 %296  ;;  %v348_v40 = vadd.f32 %v332_v21, %v247_v22  ;;  %v427_v3 = vmul.f32 %v368_v50, %v368_v50  ;;  %v393_v8 = vsel %vm377_vm1, %v368_v50, 0.0  ;;  %v449_v22 = vadd.f32 %v448_v7, %v447_v13 }
  0xbf   : > { %v333_v27 = vmul.f32 %v591_v29, %v297_v23  ;;  %v207_v28 = vpop.permute.xlu1 %206  ;;  %v394_v23 = vadd.f32 %v393_v8, %v392_v14 }
  0xc0   : > { %v248_v34 = vmul.f32 %v597_v32, %v207_v28  ;;  %v369_v57 = vadd.f32 %v607_v43, %v348_v40  ;;  %v450_v18 = vsel %vm377_vm1, %v427_v3, 0.0 }
  0xc1   : > { %v451_v30 = vadd.f32 %v450_v18, %v449_v22 }
  0xc2   : > { %v301_v41 = vpop.permute.xlu0 %300  ;;  %v349_v45 = vadd.f32 %v333_v27, %v248_v34  ;;  %v428_v9 = vmul.f32 %v369_v57, %v369_v57  ;;  %v395_v19 = vsel %vm377_vm1, %v369_v57, 0.0 }
  0xc3   : > { %v334_v46 = vmul.f32 %v591_v29, %v301_v41  ;;  %v212_v47 = vpop.permute.xlu1 %211  ;;  %v396_v31 = vadd.f32 %v395_v19, %v394_v23  ;;  %v418_v19 = vld [vmem:[%s700_s2 + $0x1] sm:$0x1] }
  0xc4   : > { %v249_v51 = vmul.f32 %v597_v32, %v212_v47  ;;  %v370_v62 = vadd.f32 %v607_v43, %v349_v45  ;;  %v452_v24 = vsel %vm377_vm1, %v428_v9, 0.0 }
  0xc5   : > { %v453_v40 = vadd.f32 %v452_v24, %v451_v30 }
  0xc6   : > { %v350_v58 = vadd.f32 %v334_v46, %v249_v51  ;;  %v305_v59 = vpop.permute.xlu0 %304  ;;  %v429_v15 = vmul.f32 %v370_v62, %v370_v62  ;;  %v397_v25 = vsel %vm377_vm1, %v370_v62, 0.0 }
  0xc7   : > { %v335_v63 = vmul.f32 %v591_v29, %v305_v59  ;;  %v217_v0 = vpop.permute.xlu1 %216  ;;  %v398_v41 = vadd.f32 %v397_v25, %v396_v31 }
  0xc8   : > { %v250_v4 = vmul.f32 %v597_v32, %v217_v0  ;;  %v371_v10 = vadd.f32 %v607_v43, %v350_v58  ;;  %v454_v33 = vsel %vm377_vm1, %v429_v15, 0.0 }
  0xc9   : > { %v455_v48 = vadd.f32 %v454_v33, %v453_v40 }
  0xca   : > { %v351_v11 = vadd.f32 %v335_v63, %v250_v4  ;;  %v309_v12 = vpop.permute.xlu0 %308  ;;  %v430_v26 = vmul.f32 %v371_v10, %v371_v10  ;;  %v399_v36 = vsel %vm377_vm1, %v371_v10, 0.0 }
  0xcb   : > { %v336_v16 = vmul.f32 %v591_v29, %v309_v12  ;;  %v222_v17 = vpop.permute.xlu1 %221  ;;  %v400_v49 = vadd.f32 %v399_v36, %v398_v41 }
  0xcc   : > { %v372_v20 = vadd.f32 %v607_v43, %v351_v11  ;;  %v251_v21 = vmul.f32 %v597_v32, %v222_v17  ;;  %v456_v42 = vsel %vm377_vm1, %v430_v26, 0.0 }
  0xcd   : > { %v457_v56 = vadd.f32 %v456_v42, %v455_v48 }
  0xce   : > { %v352_v27 = vadd.f32 %v336_v16, %v251_v21  ;;  %v313_v28 = vpop.permute.xlu0 %312  ;;  %v431_v37 = vmul.f32 %v372_v20, %v372_v20  ;;  %v401_v44 = vsel %vm377_vm1, %v372_v20, 0.0 }
  0xcf   : > { %v337_v34 = vmul.f32 %v591_v29, %v313_v28  ;;  %v227_v35 = vpop.permute.xlu1 %226  ;;  %v402_v57 = vadd.f32 %v401_v44, %v400_v49 }
  0xd0   : > { %v373_v38 = vadd.f32 %v607_v43, %v352_v27  ;;  %v252_v39 = vmul.f32 %v597_v32, %v227_v35  ;;  %v458_v52 = vsel %vm377_vm1, %v431_v37, 0.0 }
  0xd1   : > { %v459_v62 = vadd.f32 %v458_v52, %v457_v56 }
  0xd2   : > { %v432_v45 = vmul.f32 %v373_v38, %v373_v38  ;;  %v353_v46 = vadd.f32 %v337_v34, %v252_v39  ;;  %v317_v47 = vpop.permute.xlu0 %316  ;;  %v403_v53 = vsel %vm377_vm1, %v373_v38, 0.0 }
  0xd3   : > { %v338_v50 = vmul.f32 %v591_v29, %v317_v47  ;;  %v232_v51 = vpop.permute.xlu1 %231  ;;  %v404_v63 = vadd.f32 %v403_v53, %v402_v57 }
  0xd4   : > { %v374_v54 = vadd.f32 %v607_v43, %v353_v46  ;;  %v253_v55 = vmul.f32 %v597_v32, %v232_v51  ;;  %v460_v58 = vsel %vm377_vm1, %v432_v45, 0.0 }
  0xd5   : > { %v461_v1 = vadd.f32 %v460_v58, %v459_v62 }
  0xd6   : > { %v405_v59 = vsel %vm377_vm1, %v374_v54, 0.0  ;;  %v433_v60 = vmul.f32 %v374_v54, %v374_v54  ;;  %v354_v61 = vadd.f32 %v338_v50, %v253_v55 }
  0xd7   : > { %v406_v2 = vadd.f32 %v405_v59, %v404_v63 }
  0xd8   : > { %v462_v29 = vsel %vm377_vm1, %v433_v60, 0.0  ;;  %v375_v0 = vadd.f32 %v607_v43, %v354_v61  ;;  %v376_v43 = vld [vmem:[%s700_s2] sm:$0x1] }
  0xd9   : > { %v463_v32 = vadd.f32 %v462_v29, %v461_v1 }
  0xda   : > { %v407_v3 = vsel %vm377_vm1, %v375_v0, 0.0  ;;  %v434_v4 = vmul.f32 %v375_v0, %v375_v0 }
  0xdb   : > { %v408_v5 = vadd.f32 %v407_v3, %v406_v2 }
  0xdc   : > { %v464_v6 = vsel %vm377_vm1, %v434_v4, 0.0 }
  0xdd   : > { %v409_v7 = vrot.slane %v408_v5, 4  ;;  %v465_v8 = vadd.f32 %v464_v6, %v463_v32 }
  0xdf   : > { %v410_v9 = vadd.f32 %v409_v7, %v408_v5  ;;  %v466_v10 = vrot.slane %v465_v8, 4 }
  0xe1   : > { %v411_v11 = vrot.slane %v410_v9, 2  ;;  %v467_v12 = vadd.f32 %v466_v10, %v465_v8 }
  0xe3   : > { %v412_v13 = vadd.f32 %v411_v11, %v410_v9  ;;  %v468_v14 = vrot.slane %v467_v12, 2 }
  0xe5   : > { %v413_v15 = vrot.slane %v412_v13, 1  ;;  %v469_v16 = vadd.f32 %v468_v14, %v467_v12 }
  0xe7   : > { %v414_v17 = vadd.f32 %v413_v15, %v412_v13  ;;  %v470_v18 = vrot.slane %v469_v16, 1 }
  0xe9   : > { %v415_v20 = vadd.f32 %v414_v17, %v376_v43  ;;  %v471_v21 = vadd.f32 %v470_v18, %v469_v16 }
  0xeb   : > { %417 = vst.msk [vmem:[%s700_s2] sm:$0x1] %vm416_vm2, %v415_v20  ;;  %v472_v22 = vadd.f32 %v471_v21, %v418_v19 }
  0xed   : > { %473 = vst.msk [vmem:[%s700_s2 + $0x1] sm:$0x1] %vm416_vm2, %v472_v22 }
  0xee PF: > { %s12_s9 = sadd.s32 1, %s536_s9  }
  0xef   : > { %p9_p5 = scmp.ge.s32.totalorder %s12_s9, 4  }
  0xf1   :  { %11 = sbr.rel (!%p9_p5) target bundleno = 1 (0x1), region = 58 }

// kernel: linear_body_forward.5
= control target key start
LH: loop header
LB: loop body
LE: loop exit
PB: predicated region body
PF: predicated region fallthrough
CT: control target
= control target key end

     0   :  { %9 = vsyncpa [#allocation3], 0  ;;  %s1760_s0 = inlined_call_operand.vmem [shape: f32[24,32], index: 0, kind: input, shape index: {}]   ;;  %s1761_s1 = inlined_call_operand.vmem [shape: f32[256,2], index: 1, kind: input, shape index: {}]   ;;  %s1762_s2 = inlined_call_operand.vmem [shape: f32[256,256], index: 2, kind: input, shape index: {}]   ;;  %s1763_s3 = inlined_call_operand.vmem [shape: f32[8,256], index: 3, kind: input, shape index: {}]   ;;  %s1764_s4 = inlined_call_operand.hbm [shape: f32[1,256], index: 4, kind: output, shape index: {}]  }
   0x1   :  { %11 = vsyncpa [#allocation3 + $0x1], 0  ;;  %s1283_s15 = smov 0   ;;  %s1285_s16 = smov 0  }
   0x2   :  { %s1287_s17 = smov 0   ;;  %s1289_s18 = smov 0  }
   0x3 LB: > { %s970_s19 = sadd.s32 4294967295, %s1248_s18   ;;  %s971_s20 = sadd.s32 4294967294, %s1248_s18   ;;  %s1248_s18 = sphi %s1289_s18, %s1772_s18   ;;  %s1244_s17 = sphi %s1287_s17, %s1771_s17   ;;  %s1240_s16 = sphi %s1285_s16, %s1770_s16   ;;  %s1236_s15 = sphi %s1283_s15, %s1769_s15  }
   0x4   : > { %s1306_s21 = sadd.s32 1, %s1248_s18   ;;  %s118_s22 = sadd.s32 1, %s1244_s17 }
   0x5   : > { %s115_s23 = ssub.s32 %s1248_s18, %s1306_s21  ;;  %p128_p0 = scmp.ne.s32.totalorder %s1244_s17, %s1240_s16 }
   0x6   : > { %p116_p1 = scmp.eq.s32.totalorder %s115_s23, 0  ;;  %p129_p2 = scmp.eq.s32.totalorder %s970_s19, 1 }
   0x7   : > { %p134_p3 = scmp.ne.s32.totalorder %s1240_s16, %s1236_s15  ;;  %p135_p4 = scmp.eq.s32.totalorder %s971_s20, 1 }
   0x8   : > { %s1316_s24 = scalar_select %p116_p1, %s1244_s17, %s118_s22  }
   0x9   : > { %p1318_p5 = por %p129_p2, %p128_p0  ;;  %p1322_p6 = por %p135_p4, %p134_p3 }
   0xa   : > { %p974_p7 = scmp.ge.s32.totalorder %s1248_s18, 1  ;;  %p178_p8 = scmp.lt.s32.totalorder %s1248_s18, 3 }
   0xc   : > { %p179_p9 = pnand %p974_p7, %p178_p8 }
   0xd   : > { %s1328_s27 = sshll.u32 (!%p179_p9), %s970_s19, 4  ;;  %v1250_v0 = vmov (!%p179_p9), 1   ;;  %v1441_v46 = vld [vmem:[%s1760_s0 + $0x3] sm:$0x1] (!%p179_p9)  ;;  %vm1253_vm0 = vmmov (!%p179_p9), 0   ;;  %vm516_vm2 = vcmask (!%p179_p9), 261120  }
   0xe   : > { %182 = sbr.rel (%p179_p9) target bundleno = 595 (0x253), region = 36  ;;  %p210_p10 = scmp.lt.s32.totalorder (!%p179_p9), %s1328_s27, 31  ;;  %1136 = vset.pattern.permute.xlu1 (!%p179_p9), %v1250_v0  ;;  %1137 = vset.pattern.permute.xlu0 (!%p179_p9), %v1250_v0  ;;  %1088 = vpush (!%p179_p9), %v1441_v46  ;;  %vm1628_vm4 = vmpackc.low (!%p179_p9), %vm516_vm2, %vm516_vm2 }
   0xf   : > { %s1718_s14 = scalar_lea.hbm (!%p179_p9), %s1764_s4, %s1328_s27  ;;  %s1257_s22 = smov (!%p179_p9), [#allocation2]  }
  0x10   : > { %s1190_s23 = sshll.u32 (!%p179_p9), %s1257_s22, 4  ;;  %s1191_s23 = int_to_ptr.vmem [resolvable:$false] %s1190_s23 }
  0x15   : > { %s1334_s28 = scalar_select %p210_p10, %s1328_s27, 31 }
  0x17   : > { %s1003_s29 = sshll.u32 %s1334_s28, 4  ;;  %s976_s9 = sshll.u32 %s1334_s28, 3 }
  0x18   : > { %s1340_s6 = scalar_lea.vmem %s1762_s2, %s1003_s29  ;;  %s1492_s12 = scalar_lea.vmem %s1761_s1, %s976_s9 }
  0x19   : > { %v1343_v1 = vld [vmem:[%s1340_s6 + $0x20] sm:$0xff]  ;;  %v1346_v2 = vld [vmem:[%s1340_s6 + $0x28] sm:$0xff]  ;;  %v1361_v8 = vld [vmem:[%s1340_s6 + $0x30] sm:$0xff]  ;;  %s207_s9 = sand.u32 1, %s1240_s16   ;;  %s1192_s28 = scalar_lea.vmem %s1191_s23, 32 }
  0x1a   : > { %v1349_v3 = vld [vmem:[%s1340_s6] sm:$0xff]  ;;  %v679_v4 = vmul.f32 %v1343_v1, %v1343_v1  ;;  %v680_v5 = vmul.f32 %v1346_v2, %v1346_v2  ;;  %v1356_v6 = vld [vmem:[%s1340_s6 + $0x8] sm:$0xff]  ;;  %v1364_v9 = vld [vmem:[%s1340_s6 + $0x38] sm:$0xff]  ;;  %v681_v11 = vmul.f32 %v1361_v8, %v1361_v8  ;;  %s208_s10 = scalar_lea.vmem [#allocation2], %s207_s9  ;;  %s892_s19 = scalar_lea.sflag [#allocation3], %s207_s9 }
  0x1b   : > { %v675_v7 = vmul.f32 %v1349_v3, %v1349_v3  ;;  %v676_v10 = vmul.f32 %v1356_v6, %v1356_v6  ;;  %v682_v12 = vmul.f32 %v1364_v9, %v1364_v9  ;;  %v1373_v13 = vld [vmem:[%s1340_s6 + $0x10] sm:$0xff]  ;;  %v1376_v14 = vld [vmem:[%s1340_s6 + $0x18] sm:$0xff]  ;;  %v1389_v20 = vld [vmem:[%s1340_s6 + $0x40] sm:$0xff]  ;;  %s904_s11 = sshll.u32 %s208_s10, 4  ;;  %s1720_s11 = int_to_ptr.vmem [resolvable:$true] %s904_s11 }
  0x1c   : > { %v1379_v15 = vld [vmem:[%s1340_s6 + $0x50] sm:$0xff]  ;;  %v713_v16 = vadd.f32 %v680_v5, %v679_v4  ;;  %v677_v17 = vmul.f32 %v1373_v13, %v1373_v13  ;;  %v678_v18 = vmul.f32 %v1376_v14, %v1376_v14  ;;  %v1386_v19 = vld [vmem:[%s1340_s6 + $0x58] sm:$0xff]  ;;  %v1392_v21 = vld [vmem:[%s1340_s6 + $0x48] sm:$0xff]  ;;  %v683_v27 = vmul.f32 %v1389_v20, %v1389_v20  ;;  %s1186_s20 = scalar_lea.vmem %s1720_s11, 16  ;;  %p1193_p0 = scmp.lt.s32.totalorder %s1720_s11, %s1191_s23 }
  0x1d   : > { %v707_v22 = vadd.f32 %v676_v10, %v675_v7  ;;  %v716_v23 = vadd.f32 %v682_v12, %v681_v11  ;;  %v685_v24 = vmul.f32 %v1379_v15, %v1379_v15  ;;  %v686_v25 = vmul.f32 %v1386_v19, %v1386_v19  ;;  %v1403_v29 = vld [vmem:[%s1340_s6 + $0x70] sm:$0xff]  ;;  %v1406_v30 = vld [vmem:[%s1340_s6 + $0x78] sm:$0xff]  ;;  %v1409_v31 = vld [vmem:[%s1340_s6 + $0x60] sm:$0xff]  ;;  %p1187_p11 = scmp.ne.s32.totalorder %s1720_s11, %s1186_s20  ;;  %p1194_p1 = scmp.lt.s32.totalorder %s1192_s28, %s1186_s20 }
  0x1e   : > { %714 = vadd.xlane.f32.xlu1 %v713_v16  ;;  %v710_v26 = vadd.f32 %v678_v18, %v677_v17  ;;  %v684_v28 = vmul.f32 %v1392_v21, %v1392_v21  ;;  %v1412_v32 = vld [vmem:[%s1340_s6 + $0x68] sm:$0xff]  ;;  %v689_v34 = vmul.f32 %v1403_v29, %v1403_v29  ;;  %v690_v35 = vmul.f32 %v1406_v30, %v1406_v30  ;;  %v1423_v39 = vld [vmem:[%s1340_s6 + $0x80] sm:$0xff]  ;;  %v1429_v41 = vld [vmem:[%s1340_s6 + $0x90] sm:$0xff] }
  0x1f   : > { %708 = vadd.xlane.f32.xlu0 %v707_v22  ;;  %v722_v33 = vadd.f32 %v686_v25, %v685_v24  ;;  %v687_v37 = vmul.f32 %v1409_v31, %v1409_v31  ;;  %v688_v38 = vmul.f32 %v1412_v32, %v1412_v32  ;;  %v1426_v40 = vld [vmem:[%s1340_s6 + $0x88] sm:$0xff]  ;;  %v1432_v42 = vld [vmem:[%s1340_s6 + $0x98] sm:$0xff]  ;;  %v691_v44 = vmul.f32 %v1423_v39, %v1423_v39  ;;  %v1448_v50 = vld [vmem:[%s1340_s6 + $0xa0] sm:$0xff]  ;;  %p1188_p12 = pnand %p1187_p11, %p1318_p5  ;;  %p1195_p2 = por %p1194_p1, %p1193_p0 }
  0x20   : > { %v719_v36 = vadd.f32 %v684_v28, %v683_v27  ;;  %v728_v43 = vadd.f32 %v690_v35, %v689_v34  ;;  %v692_v45 = vmul.f32 %v1426_v40, %v1426_v40  ;;  %v693_v48 = vmul.f32 %v1429_v41, %v1429_v41  ;;  %v1451_v51 = vld [vmem:[%s1340_s6 + $0xa8] sm:$0xff]  ;;  %v1455_v52 = vld [vmem:[%s1340_s6 + $0xb0] sm:$0xff]  ;;  %v1458_v53 = vld [vmem:[%s1340_s6 + $0xb8] sm:$0xff] }
  0x21   : > { %v725_v47 = vadd.f32 %v688_v38, %v687_v37  ;;  %v694_v49 = vmul.f32 %v1432_v42, %v1432_v42  ;;  %v695_v55 = vmul.f32 %v1448_v50, %v1448_v50  ;;  %v696_v56 = vmul.f32 %v1451_v51, %v1451_v51  ;;  %v1469_v60 = vld [vmem:[%s1340_s6 + $0xc0] sm:$0xff]  ;;  %v1472_v61 = vld [vmem:[%s1340_s6 + $0xc8] sm:$0xff]  ;;  %v1475_v62 = vld [vmem:[%s1340_s6 + $0xd0] sm:$0xff]  ;;  %p1189_p13 = pneg %p1188_p12 }
  0x22   : > { %717 = vadd.xlane.f32.xlu1 %v716_v23  ;;  %v731_v54 = vadd.f32 %v692_v45, %v691_v44  ;;  %v697_v58 = vmul.f32 %v1455_v52, %v1455_v52  ;;  %v698_v59 = vmul.f32 %v1458_v53, %v1458_v53  ;;  %v1478_v63 = vld [vmem:[%s1340_s6 + $0xd8] sm:$0xff]  ;;  %v699_v5 = vmul.f32 %v1469_v60, %v1469_v60  ;;  %v223_v18 = vld [vmem:[%s1492_s12] sm:$0xff]  ;;  %v224_v22 = vld [vmem:[%s1492_s12 + $0x8] sm:$0xff] }
  0x23   : > { %711 = vadd.xlane.f32.xlu0 %v710_v26  ;;  %v734_v57 = vadd.f32 %v694_v49, %v693_v48  ;;  %v737_v4 = vadd.f32 %v696_v56, %v695_v55  ;;  %v700_v7 = vmul.f32 %v1472_v61, %v1472_v61  ;;  %v701_v11 = vmul.f32 %v1475_v62, %v1475_v62  ;;  %v230_v23 = vld [vmem:[%s1492_s12 + $0x38] sm:$0xff]  ;;  %v225_v24 = vld [vmem:[%s1492_s12 + $0x10] sm:$0xff]  ;;  %v227_v27 = vld [vmem:[%s1492_s12 + $0x20] sm:$0xff]  ;;  %p1196_p3 = pnand %p1195_p2, %p1189_p13 }
  0x24   : > { %v740_v10 = vadd.f32 %v698_v59, %v697_v58  ;;  %v702_v12 = vmul.f32 %v1478_v63, %v1478_v63  ;;  %v226_v25 = vld [vmem:[%s1492_s12 + $0x18] sm:$0xff]  ;;  %v1251_v26 = vmov 0   ;;  %v228_v28 = vld [vmem:[%s1492_s12 + $0x28] sm:$0xff]  ;;  %v1505_v34 = vld [vmem:[%s1340_s6 + $0xf0] sm:$0xff]  ;;  %v1252_v56 = vmov 0.0|0.0  }
  0x25   : > { %v743_v16 = vadd.f32 %v700_v7, %v699_v5  ;;  %v1508_v35 = vld [vmem:[%s1340_s6 + $0xf8] sm:$0xff]  ;;  %v1515_v38 = vld [vmem:[%s1340_s6 + $0xe0] sm:$0xff]  ;;  %v232_v49 = vld [vmem:[%s1492_s12 + $0x48] sm:$0xff]  ;;  %1056 = vmatprep.subr.bf16.mxu0 %v1252_v56 }
  0x26   : > { %723 = vadd.xlane.f32.xlu1 %v722_v33  ;;  %v746_v17 = vadd.f32 %v702_v12, %v701_v11  ;;  %v229_v33 = vld [vmem:[%s1492_s12 + $0x30] sm:$0xff]  ;;  %v706_v37 = vmul.f32 %v1508_v35, %v1508_v35  ;;  %v703_v45 = vmul.f32 %v1515_v38, %v1515_v38  ;;  %v1531_v55 = vld [vmem:[%s1492_s12 + $0x78] sm:$0xff] }
  0x27   : > { %720 = vadd.xlane.f32.xlu0 %v719_v36  ;;  %v705_v36 = vmul.f32 %v1505_v34, %v1505_v34 }
  0x29   : > { %v752_v44 = vadd.f32 %v706_v37, %v705_v36 }
  0x2a   : > { %729 = vadd.xlane.f32.xlu1 %v728_v43  ;;  %v1518_v43 = vld [vmem:[%s1340_s6 + $0xe8] sm:$0xff] }
  0x2b   : > { %726 = vadd.xlane.f32.xlu0 %v725_v47  ;;  %v704_v47 = vmul.f32 %v1518_v43, %v1518_v43 }
  0x2d   : > { %v749_v48 = vadd.f32 %v704_v47, %v703_v45 }
  0x2e   : > { %732 = vadd.xlane.f32.xlu1 %v731_v54  ;;  %v1526_v54 = vld [vmem:[%s1492_s12 + $0x60] sm:$0xff] }
  0x2f   : > { %735 = vadd.xlane.f32.xlu0 %v734_v57  ;;  %v231_v57 = vld [vmem:[%s1492_s12 + $0x40] sm:$0xff] }
  0x32   : > { %738 = vadd.xlane.f32.xlu1 %v737_v4 }
  0x33   : > { %741 = vadd.xlane.f32.xlu0 %v740_v10  ;;  %v233_v10 = vld [vmem:[%s1492_s12 + $0x50] sm:$0xff] }
  0x36   : > { %744 = vadd.xlane.f32.xlu1 %v743_v16 }
  0x37   : > { %747 = vadd.xlane.f32.xlu0 %v746_v17 }
  0x3f   : > { %s1089_s30 = spop %1088 }
  0x47   : > { %342 = vperm.xlu1 %1136, %v223_v18  }
  0x4b   : > { %346 = vperm.xlu1 %1136, %v224_v22  }
  0x4d   : > { %370 = vperm.xlu0 %1137, %v230_v23  }
  0x4f   : > { %350 = vperm.xlu1 %1136, %v225_v24  }
  0x51   : > { %1138 = vset.pattern.permute.xlu0 %v1251_v26 }
  0x52   : > { %242 = vperm.xlu0 %1138, %v223_v18   ;;  %v234_v18 = vld [vmem:[%s1492_s12 + $0x58] sm:$0xff] }
  0x53   : > { %354 = vperm.xlu1 %1136, %v226_v25  }
  0x56   : > { %257 = vperm.xlu0 %1138, %v226_v25  }
  0x57   : > { %358 = vperm.xlu1 %1136, %v227_v27  }
  0x5a   : > { %267 = vperm.xlu0 %1138, %v228_v28  }
  0x5b   : > { %362 = vperm.xlu1 %1136, %v228_v28  }
  0x5e   : > { %272 = vperm.xlu0 %1138, %v229_v33  }
  0x5f   : > { %366 = vperm.xlu1 %1136, %v229_v33  }
  0x63   : > { %1139 = vset.pattern.permute.xlu1 %v1251_v26 }
  0x7d   : > { %753 = vadd.xlane.f32.xlu0 %v752_v44 }
  0x83   : > { %750 = vadd.xlane.f32.xlu1 %v749_v48 }
  0x93   : > { %287 = vperm.xlu0 %1138, %v232_v49  }
  0x94   : > { %247 = vperm.xlu1 %1139, %v224_v22  }
  0x97   : > { %1144 = vset.pattern.permute.xlu0 %v1250_v0 }
  0x98   : > { %252 = vperm.xlu1 %1139, %v225_v24   ;;  %390 = vperm.xlu0 %1144, %v1526_v54  }
  0x9c   : > { %262 = vperm.xlu1 %1139, %v227_v27   ;;  %1147 = vset.pattern.permute.xlu0 %v1251_v26 }
  0x9d   : > { %317 = vperm.xlu0 %1147, %v1531_v55  }
  0xa0   : > { %277 = vperm.xlu1 %1139, %v230_v23  }
  0xa4   : > { %282 = vperm.xlu1 %1139, %v231_v57  }
  0xa8   : > { %1140 = vset.pattern.permute.xlu1 %v1250_v0 }
  0xa9   : > { %374 = vperm.xlu1 %1140, %v231_v57  }
  0xab   : > { %v715_v58 = vpop.xlane.xlu1 %714 }
  0xac   : > { %v709_v59 = vpop.xlane.xlu0 %708  ;;  %v757_v4 = vadd.f32 1e-08, %v715_v58 }
  0xad   : > { %v755_v5 = vadd.f32 1e-08, %v709_v59  ;;  %378 = vperm.xlu1 %1140, %v232_v49  }
  0xaf   : > { %1152 = vrsqrt.f32 %v755_v5  ;;  %v718_v7 = vpop.xlane.xlu1 %717 }
  0xb0   : > { %v758_v11 = vadd.f32 1e-08, %v718_v7  ;;  %v712_v12 = vpop.xlane.xlu0 %711  ;;  %1154 = vrsqrt.f32 %v757_v4 }
  0xb1   : > { %v756_v16 = vadd.f32 1e-08, %v712_v12  ;;  %1141 = vset.pattern.permute.xlu1 %v1251_v26 }
  0xb2   : > { %1156 = vrsqrt.f32 %v758_v11  ;;  %292 = vperm.xlu1 %1141, %v233_v10  }
  0xb3   : > { %1158 = vrsqrt.f32 %v756_v16  ;;  %v724_v17 = vpop.xlane.xlu1 %723 }
  0xb4   : > { %v760_v22 = vadd.f32 1e-08, %v724_v17  ;;  %v721_v23 = vpop.xlane.xlu0 %720 }
  0xb5   : > { %v759_v24 = vadd.f32 1e-08, %v721_v23 }
  0xb6   : > { %297 = vperm.xlu1 %1141, %v234_v18   ;;  %1160 = vrsqrt.f32 %v760_v22 }
  0xb7   : > { %1162 = vrsqrt.f32 %v759_v24  ;;  %v730_v27 = vpop.xlane.xlu1 %729 }
  0xb8   : > { %v727_v28 = vpop.xlane.xlu0 %726  ;;  %v762_v37 = vadd.f32 1e-08, %v730_v27 }
  0xb9   : > { %v1153_v25 = vpop.eup %1152  ;;  %v761_v48 = vadd.f32 1e-08, %v727_v28 }
  0xba   : > { %1142 = vset.pattern.permute.xlu1 %v1250_v0  ;;  %v1155_v33 = vpop.eup %1154  ;;  %v788_v44 = vmul.f32 %v1153_v25, %v1356_v6  ;;  %v787_v45 = vmul.f32 %v1153_v25, %v1349_v3  ;;  %1164 = vrsqrt.f32 %v762_v37 }
  0xbb   : > { %382 = vperm.xlu1 %1142, %v233_v10   ;;  %v792_v5 = vmul.f32 %v1155_v33, %v1346_v2  ;;  %1166 = vrsqrt.f32 %v761_v48  ;;  %v733_v7 = vpop.xlane.xlu1 %732  ;;  %v791_v17 = vmul.f32 %v1155_v33, %v1343_v1  ;;  %v836_v33 = vld [vmem:[%s1763_s3 + $0x8] sm:$0xff] }
  0xbc   : > { %v1157_v36 = vpop.eup %1156  ;;  %v736_v10 = vpop.xlane.xlu0 %735  ;;  %v838_v37 = vpack.c.bf16 %v836_v33, %v836_v33  ;;  %v1604_v33 = vld [vmem:[%s1760_s0 + $0x2] ss:$0 sm:$0xff] }
  0xbd   : > { %v1159_v47 = vpop.eup %1158  ;;  %v794_v58 = vmul.f32 %v1157_v36, %v1364_v9  ;;  %v764_v9 = vadd.f32 1e-08, %v736_v10  ;;  %v793_v12 = vmul.f32 %v1157_v36, %v1361_v8  ;;  %v237_v36 = vld [vmem:[%s1492_s12 + $0x70] sm:$0xff] }
  0xbe   : > { %v790_v49 = vmul.f32 %v1159_v47, %v1376_v14  ;;  %v789_v57 = vmul.f32 %v1159_v47, %v1373_v13  ;;  %v763_v13 = vadd.f32 1e-08, %v733_v7  ;;  %v236_v14 = vld [vmem:[%s1492_s12 + $0x68] sm:$0xff]  ;;  %871 = vmatprep.mubr.bf16.mxu1 %v838_v37 }
  0xbf   : > { %386 = vperm.xlu1 %1142, %v234_v18   ;;  %v822_v3 = vpack.c.bf16 %v794_v58, %v792_v5  ;;  %v739_v18 = vpop.xlane.xlu1 %738  ;;  %v821_v22 = vpack.c.bf16 %v793_v12, %v791_v17 }
  0xc0   : > { %v820_v59 = vpack.c.bf16 %v790_v49, %v788_v44  ;;  %v819_v4 = vpack.c.bf16 %v789_v57, %v787_v45  ;;  %v1161_v6 = vpop.eup %1160  ;;  %1168 = vrsqrt.f32 %v763_v13  ;;  %v742_v24 = vpop.xlane.xlu0 %741  ;;  %v765_v27 = vadd.f32 1e-08, %v739_v18 }
  0xc1   : > { %v1163_v11 = vpop.eup %1162  ;;  %v798_v16 = vmul.f32 %v1161_v6, %v1386_v19  ;;  %1170 = vrsqrt.f32 %v764_v9  ;;  %v766_v8 = vadd.f32 1e-08, %v742_v24  ;;  %v797_v1 = vmul.f32 %v1161_v6, %v1379_v15 }
  0xc2   : > { %839 = vmatprep.subr.bf16.mxu1 %v820_v59  ;;  %v796_v2 = vmul.f32 %v1163_v11, %v1392_v21  ;;  %v795_v19 = vmul.f32 %v1163_v11, %v1389_v20  ;;  %1172 = vrsqrt.f32 %v765_v27 }
  0xc3   : > { %840 = vmatpush1.bf16.xpose.msra.mxu1 %v819_v4  ;;  %1143 = vset.pattern.permute.xlu1 %v1251_v26  ;;  %1174 = vrsqrt.f32 %v766_v8  ;;  %v745_v44 = vpop.xlane.xlu1 %744 }
  0xc4   : > { %841 = vmatprep.subr.bf16.mxu1 %v822_v3  ;;  %302 = vperm.xlu1 %1143, %v1526_v54   ;;  %v1165_v23 = vpop.eup %1164  ;;  %v824_v25 = vpack.c.bf16 %v798_v16, %v796_v2  ;;  %v823_v45 = vpack.c.bf16 %v797_v1, %v795_v19  ;;  %v748_v47 = vpop.xlane.xlu0 %747 }
  0xc5   : > { %v1167_v54 = vpop.eup %1166  ;;  %v802_v28 = vmul.f32 %v1165_v23, %v1406_v30  ;;  %v767_v30 = vadd.f32 1e-08, %v745_v44  ;;  %v768_v48 = vadd.f32 1e-08, %v748_v47  ;;  %v801_v57 = vmul.f32 %v1165_v23, %v1403_v29 }
  0xc6   : > { %v800_v21 = vmul.f32 %v1167_v54, %v1412_v32  ;;  %v799_v49 = vmul.f32 %v1167_v54, %v1409_v31  ;;  %v1595_v54 = vld [vmem:[%s1760_s0 + $0x1] ss:$0 sm:$0xff] }
  0xc7   : > { %1176 = vrsqrt.f32 %v767_v30 }
  0xc8   : > { %307 = vperm.xlu1 %1143, %v236_v14   ;;  %v826_v15 = vpack.c.bf16 %v802_v28, %v800_v21  ;;  %1178 = vrsqrt.f32 %v768_v48  ;;  %v825_v59 = vpack.c.bf16 %v801_v57, %v799_v49 }
  0xca   : > { %v1169_v20 = vpop.eup %1168 }
  0xcb   : > { %842 = vmatpush1.bf16.xpose.msra.mxu1 %v821_v22  ;;  %v1171_v32 = vpop.eup %1170  ;;  %v804_v58 = vmul.f32 %v1169_v20, %v1426_v40  ;;  %v803_v31 = vmul.f32 %v1169_v20, %v1423_v39 }
  0xcc   : > { %843 = vmatprep.subr.bf16.mxu1 %v824_v25  ;;  %1145 = vset.pattern.permute.xlu1 %v1250_v0  ;;  %v1173_v4 = vpop.eup %1172  ;;  %v805_v29 = vmul.f32 %v1171_v32, %v1429_v41  ;;  %v1254_v41 = vmov 0.0   ;;  %v1590_v25 = vld [vmem:[%s1760_s0] ss:$0 sm:$0xff] }
  0xcd   : > { %394 = vperm.xlu1 %1145, %v236_v14   ;;  %v1175_v7 = vpop.eup %1174  ;;  %v807_v11 = vmul.f32 %v1173_v4, %v1448_v50  ;;  %1053 = vmatprep.mubr.msk.f32.mxu0 %vm1253_vm0, %v1254_v41  ;;  %v1255_v50 = vmov 3  }
  0xce   : > { %v810_v40 = vmul.f32 %v1175_v7, %v1458_v53  ;;  %v809_v13 = vmul.f32 %v1175_v7, %v1455_v52  ;;  %v1256_v52 = vmov 2  }
  0xcf   : > { %1149 = vset.pattern.permute.xlu0 %v1256_v52 }
  0xd0   : > { %v829_v9 = vpack.c.bf16 %v809_v13, %v807_v11  ;;  %639 = vperm.xlu0 %1149, %v1441_v46  }
  0xd1   : > { %1146 = vset.pattern.permute.xlu1 %v1251_v26  ;;  %v806_v26 = vmul.f32 %v1171_v32, %v1432_v42  ;;  %v827_v42 = vpack.c.bf16 %v805_v29, %v803_v31  ;;  %v1177_v6 = vpop.eup %1176 }
  0xd2   : > { %312 = vperm.xlu1 %1146, %v237_v36   ;;  %v1179_v3 = vpop.eup %1178  ;;  %v811_v14 = vmul.f32 %v1177_v6, %v1469_v60 }
  0xd3   : > { %844 = vmatpush1.bf16.xpose.msra.mxu1 %v823_v45  ;;  %v828_v5 = vpack.c.bf16 %v806_v26, %v804_v58  ;;  %v814_v39 = vmul.f32 %v1179_v3, %v1478_v63  ;;  %v813_v12 = vmul.f32 %v1179_v3, %v1475_v62 }
  0xd4   : > { %845 = vmatprep.subr.bf16.mxu1 %v826_v15  ;;  %1151 = vset.pattern.permute.xlu0 %v1255_v50  ;;  %v1610_v15 = vstv %s1089_s30 }
  0xd5   : > { %v831_v63 = vpack.c.bf16 %v813_v12, %v811_v14 }
  0xd6   : > { %1148 = vset.pattern.permute.xlu1 %v1250_v0  ;;  %v808_v0 = vmul.f32 %v1173_v4, %v1451_v51  ;;  %v343_v51 = vpop.permute.xlu1 %342 }
  0xd7   : > { %398 = vperm.xlu1 %1148, %v237_v36   ;;  %v409_v1 = vmul.f32 %v1595_v54, %v343_v51 }
  0xd8   : > { %v830_v10 = vpack.c.bf16 %v810_v40, %v808_v0 }
  0xda   : > { %v347_v2 = vpop.permute.xlu1 %346 }
  0xdb   : > { %846 = vmatpush1.bf16.xpose.msra.mxu1 %v825_v59  ;;  %402 = vperm.xlu1 %1148, %v1531_v55   ;;  %v812_v55 = vmul.f32 %v1177_v6, %v1472_v61  ;;  %v1583_v61 = vpop.permute.xlu0 %370  ;;  %v410_v47 = vmul.f32 %v1595_v54, %v347_v2 }
  0xdc   : > { %847 = vmatprep.subr.bf16.mxu1 %v828_v5 }
  0xdd   : > { %v832_v53 = vpack.c.bf16 %v814_v39, %v812_v55 }
  0xde   : > { %v351_v16 = vpop.permute.xlu1 %350 }
  0xdf   : > { %1150 = vset.pattern.permute.xlu1 %v1255_v50  ;;  %v243_v17 = vpop.permute.xlu0 %242  ;;  %v411_v26 = vmul.f32 %v1595_v54, %v351_v16  ;;  %v835_v16 = vld [vmem:[%s1763_s3] sm:$0xff] }
  0xe0   : > { %885 = vperm.xlu1 %1150, %v1441_v46   ;;  %v324_v8 = vmul.f32 %v1590_v25, %v243_v17 }
  0xe2   : > { %v355_v18 = vpop.permute.xlu1 %354  ;;  %v425_v21 = vadd.f32 %v409_v1, %v324_v8 }
  0xe3   : > { %848 = vmatpush1.bf16.xpose.msra.mxu1 %v827_v42  ;;  %v258_v60 = vpop.permute.xlu0 %257  ;;  %v412_v37 = vmul.f32 %v1595_v54, %v355_v18 }
  0xe4   : > { %849 = vmatprep.subr.bf16.mxu1 %v830_v10  ;;  %v327_v44 = vmul.f32 %v1590_v25, %v258_v60  ;;  %v446_v45 = vadd.f32 %v1604_v33, %v425_v21 }
  0xe6   : > { %v359_v22 = vpop.permute.xlu1 %358  ;;  %v428_v30 = vadd.f32 %v412_v37, %v327_v44  ;;  %v483_v57 = vmul.f32 %v1610_v15, %v446_v45  ;;  %vm463_vm1 = vcmp.ge.f32.partialorder %v446_v45, 0.0 }
  0xe7   : > { %v268_v62 = vpop.permute.xlu0 %267  ;;  %v413_v5 = vmul.f32 %v1595_v54, %v359_v22  ;;  %v416_v22 = vmul.f32 %v1595_v54, %v1583_v61 }
  0xe8   : > { %v449_v7 = vadd.f32 %v1604_v33, %v428_v30  ;;  %v329_v0 = vmul.f32 %v1590_v25, %v268_v62  ;;  %v499_v42 = vsel %vm463_vm1, %v446_v45, %v483_v57 }
  0xea   : > { %v363_v23 = vpop.permute.xlu1 %362  ;;  %v486_v52 = vmul.f32 %v1610_v15, %v449_v7  ;;  %vm466_vm6 = vcmp.ge.f32.partialorder %v449_v7, 0.0 }
  0xeb   : > { %850 = vmatpush1.bf16.xpose.msra.mxu1 %v829_v9  ;;  %v1585_v24 = vpop.permute.xlu0 %272  ;;  %v414_v11 = vmul.f32 %v1595_v54, %v363_v23 }
  0xec   : > { %851 = vmatprep.subr.bf16.mxu1 %v832_v53  ;;  %v330_v17 = vmul.f32 %v1590_v25, %v1585_v24  ;;  %v502_v23 = vsel %vm466_vm6, %v449_v7, %v486_v52 }
  0xed   : > { %v430_v50 = vadd.f32 %v414_v11, %v329_v0 }
  0xee   : > { %v1598_v19 = vpop.permute.xlu1 %366 }
  0xef   : > { %v415_v18 = vmul.f32 %v1595_v54, %v1598_v19  ;;  %v451_v62 = vadd.f32 %v1604_v33, %v430_v50 }
  0xf1   : > { %v431_v21 = vadd.f32 %v415_v18, %v330_v17  ;;  %v488_v19 = vmul.f32 %v1610_v15, %v451_v62  ;;  %vm468_vm8 = vcmp.ge.f32.partialorder %v451_v62, 0.0 }
  0xf3   : > { %852 = vmatpush1.bf16.xpose.msra.mxu1 %v831_v63  ;;  %v452_v37 = vadd.f32 %v1604_v33, %v431_v21 }
  0xf5   : > { %vm469_vm10 = vcmp.ge.f32.partialorder %v452_v37, 0.0 }
 0x10a   : > { %v754_v46 = vpop.xlane.xlu0 %753 }
 0x10b   : > { %v770_v27 = vadd.f32 1e-08, %v754_v46 }
 0x10d   : > { %1180 = vrsqrt.f32 %v770_v27  ;;  %v837_v27 = vpack.c.bf16 %v835_v16, %v835_v16 }
 0x110   : > { %v751_v28 = vpop.xlane.xlu1 %750 }
 0x111   : > { %v769_v36 = vadd.f32 1e-08, %v751_v28 }
 0x112   : > { %v288_v61 = vpop.permute.xlu0 %287 }
 0x113   : > { %1182 = vrsqrt.f32 %v769_v36  ;;  %v333_v45 = vmul.f32 %v1590_v25, %v288_v61 }
 0x114   : > { %v248_v20 = vpop.permute.xlu1 %247 }
 0x115   : > { %v325_v32 = vmul.f32 %v1590_v25, %v248_v20 }
 0x117   : > { %v426_v48 = vadd.f32 %v410_v47, %v325_v32  ;;  %v1181_v58 = vpop.eup %1180  ;;  %v504_v32 = vsel %vm468_vm8, %v451_v62, %v488_v19 }
 0x118   : > { %v253_v49 = vpop.permute.xlu1 %252  ;;  %v818_v6 = vmul.f32 %v1181_v58, %v1508_v35  ;;  %v817_v10 = vmul.f32 %v1181_v58, %v1505_v34  ;;  %v489_v58 = vmul.f32 %v1610_v15, %v452_v37 }
 0x119   : > { %v447_v59 = vadd.f32 %v1604_v33, %v426_v48  ;;  %v326_v4 = vmul.f32 %v1590_v25, %v253_v49 }
 0x11b   : > { %v484_v31 = vmul.f32 %v1610_v15, %v447_v59  ;;  %v427_v29 = vadd.f32 %v411_v26, %v326_v4  ;;  %vm464_vm3 = vcmp.ge.f32.partialorder %v447_v59, 0.0 }
 0x11c   : > { %v263_v40 = vpop.permute.xlu1 %262 }
 0x11d   : > { %v1183_v3 = vpop.eup %1182  ;;  %v448_v13 = vadd.f32 %v1604_v33, %v427_v29  ;;  %v328_v55 = vmul.f32 %v1590_v25, %v263_v40  ;;  %v500_v39 = vsel %vm464_vm3, %v447_v59, %v484_v31  ;;  %v505_v29 = vsel %vm469_vm10, %v452_v37, %v489_v58 }
 0x11e   : > { %v1057_v51 = vpack.c.bf16 %v500_v39, %v499_v42  ;;  %v816_v9 = vmul.f32 %v1183_v3, %v1518_v43  ;;  %v815_v35 = vmul.f32 %v1183_v3, %v1515_v38 }
 0x11f   : > { %v485_v34 = vmul.f32 %v1610_v15, %v448_v13  ;;  %v429_v53 = vadd.f32 %v413_v5, %v328_v55  ;;  %vm465_vm5 = vcmp.ge.f32.partialorder %v448_v13, 0.0 }
 0x120   : > { %1059 = vmatpush3.bf16.xpose.msk.msra.mxu0 %vm1628_vm4, %v1057_v51  ;;  %v278_v14 = vpop.permute.xlu1 %277  ;;  %v834_v12 = vpack.c.bf16 %v818_v6, %v816_v9  ;;  %v833_v2 = vpack.c.bf16 %v817_v10, %v815_v35 }
 0x121   : > { %1060 = vmatprep.subr.bf16.mxu0 %v1252_v56  ;;  %v450_v43 = vadd.f32 %v1604_v33, %v429_v53  ;;  %v331_v38 = vmul.f32 %v1590_v25, %v278_v14  ;;  %v501_v63 = vsel %vm465_vm5, %v448_v13, %v485_v34  ;;  %v391_v14 = vpop.permute.xlu0 %390 }
 0x122   : > { %853 = vmatprep.subr.bf16.mxu1 %v834_v12  ;;  %v1061_v46 = vpack.c.bf16 %v502_v23, %v501_v63 }
 0x123   : > { %854 = vmatpush1.bf16.xpose.msra.mxu1 %v833_v2  ;;  %v487_v8 = vmul.f32 %v1610_v15, %v450_v43  ;;  %v432_v1 = vadd.f32 %v416_v22, %v331_v38  ;;  %vm467_vm7 = vcmp.ge.f32.partialorder %v450_v43, 0.0 }
 0x124   : > { %v283_v60 = vpop.permute.xlu1 %282 }
 0x125   : > { %v453_v28 = vadd.f32 %v1604_v33, %v432_v1  ;;  %v503_v36 = vsel %vm467_vm7, %v450_v43, %v487_v8  ;;  %v332_v49 = vmul.f32 %v1590_v25, %v283_v60  ;;  %v421_v43 = vmul.f32 %v1595_v54, %v391_v14  ;;  %v318_v37 = vpop.permute.xlu0 %317 }
 0x126   : > { %v1065_v30 = vpack.c.bf16 %v504_v32, %v503_v36 }
 0x127   : > { %v490_v48 = vmul.f32 %v1610_v15, %v453_v28  ;;  %vm470_vm9 = vcmp.ge.f32.partialorder %v453_v28, 0.0 }
 0x128   : > { %1063 = vmatpush3.bf16.xpose.msk.msra.mxu0 %vm1628_vm4, %v1061_v46  ;;  %v375_v24 = vpop.permute.xlu1 %374 }
 0x129   : > { %1064 = vmatprep.subr.bf16.mxu0 %v1252_v56  ;;  %v417_v20 = vmul.f32 %v1595_v54, %v375_v24  ;;  %v506_v5 = vsel %vm470_vm9, %v453_v28, %v490_v48 }
 0x12a   : > { %872 = vmatmul.mubr.bf16.vlgmr.msra.gmra.mrb[0].mxu1 %v837_v27  ;;  %v1069_v0 = vpack.c.bf16 %v506_v5, %v505_v29 }
 0x12b   : > { %v433_v26 = vadd.f32 %v417_v20, %v332_v49 }
 0x12c   : > { %v379_v44 = vpop.permute.xlu1 %378 }
 0x12d   : > { %v418_v47 = vmul.f32 %v1595_v54, %v379_v44  ;;  %v454_v7 = vadd.f32 %v1604_v33, %v433_v26 }
 0x12f   : > { %v434_v57 = vadd.f32 %v418_v47, %v333_v45  ;;  %v491_v42 = vmul.f32 %v1610_v15, %v454_v7  ;;  %vm471_vm12 = vcmp.ge.f32.partialorder %v454_v7, 0.0  ;;  %v339_v47 = vmul.f32 %v1590_v25, %v318_v37 }
 0x130   : > { %1067 = vmatpush3.bf16.xpose.msk.msra.mxu0 %vm1628_vm4, %v1065_v30 }
 0x131   : > { %v293_v59 = vpop.permute.xlu1 %292  ;;  %1068 = vmatprep.subr.bf16.mxu0 %v1252_v56  ;;  %v455_v4 = vadd.f32 %v1604_v33, %v434_v57  ;;  %v507_v55 = vsel %vm471_vm12, %v454_v7, %v491_v42 }
 0x132   : > { %v334_v10 = vmul.f32 %v1590_v25, %v293_v59 }
 0x133   : > { %v492_v40 = vmul.f32 %v1610_v15, %v455_v4  ;;  %vm472_vm11 = vcmp.ge.f32.partialorder %v455_v4, 0.0 }
 0x135   : > { %v298_v31 = vpop.permute.xlu1 %297  ;;  %v508_v11 = vsel %vm472_vm11, %v455_v4, %v492_v40 }
 0x136   : > { %v1073_v51 = vpack.c.bf16 %v508_v11, %v507_v55  ;;  %v335_v9 = vmul.f32 %v1590_v25, %v298_v31 }
 0x138   : > { %1071 = vmatpush3.bf16.xpose.msk.msra.mxu0 %vm1628_vm4, %v1069_v0 }
 0x139   : > { %1072 = vmatprep.subr.bf16.mxu0 %v1252_v56 }
 0x13a   : > { %v383_v6 = vpop.permute.xlu1 %382 }
 0x13b   : > { %v419_v3 = vmul.f32 %v1595_v54, %v383_v6 }
 0x13d   : > { %v435_v13 = vadd.f32 %v419_v3, %v334_v10 }
 0x13e   : > { %v387_v39 = vpop.permute.xlu1 %386 }
 0x13f   : > { %v456_v35 = vadd.f32 %v1604_v33, %v435_v13  ;;  %v420_v34 = vmul.f32 %v1595_v54, %v387_v39 }
 0x140   : > { %1075 = vmatpush3.bf16.xpose.msk.msra.mxu0 %vm1628_vm4, %v1073_v51 }
 0x141   : > { %v436_v53 = vadd.f32 %v420_v34, %v335_v9  ;;  %1076 = vmatprep.subr.bf16.mxu0 %v1252_v56  ;;  %v493_v12 = vmul.f32 %v1610_v15, %v456_v35  ;;  %vm473_vm13 = vcmp.ge.f32.partialorder %v456_v35, 0.0 }
 0x143   : > { %v457_v2 = vadd.f32 %v1604_v33, %v436_v53  ;;  %v303_v50 = vpop.permute.xlu1 %302  ;;  %v509_v16 = vsel %vm473_vm13, %v456_v35, %v493_v12 }
 0x144   : > { %v336_v38 = vmul.f32 %v1590_v25, %v303_v50 }
 0x145   : > { %vm474_vm14 = vcmp.ge.f32.partialorder %v457_v2, 0.0  ;;  %v494_v52 = vmul.f32 %v1610_v15, %v457_v2 }
 0x146   : > { %v437_v60 = vadd.f32 %v421_v43, %v336_v38 }
 0x147   : > { %v308_v63 = vpop.permute.xlu1 %307  ;;  %v510_v17 = vsel %vm474_vm14, %v457_v2, %v494_v52 }
 0x148   : > { %v1077_v18 = vpack.c.bf16 %v510_v17, %v509_v16  ;;  %v458_v62 = vadd.f32 %v1604_v33, %v437_v60  ;;  %v337_v23 = vmul.f32 %v1590_v25, %v308_v63 }
 0x14a   : > { %1079 = vmatpush3.bf16.xpose.msk.msra.mxu0 %vm1628_vm4, %v1077_v18  ;;  %v495_v8 = vmul.f32 %v1610_v15, %v458_v62  ;;  %vm475_vm15 = vcmp.ge.f32.partialorder %v458_v62, 0.0 }
 0x14b   : > { %1080 = vmatprep.subr.bf16.mxu0 %v1252_v56 }
 0x14c   : > { %v395_v22 = vpop.permute.xlu1 %394  ;;  %v511_v19 = vsel %vm475_vm15, %v458_v62, %v495_v8 }
 0x14d   : > { %v422_v46 = vmul.f32 %v1595_v54, %v395_v22 }
 0x14f   : > { %v438_v27 = vadd.f32 %v422_v46, %v337_v23  ;;  %v640_v41 = vpop.permute.xlu0 %639 }
 0x151   : > { %v459_v1 = vadd.f32 %v1604_v33, %v438_v27  ;;  %v313_v21 = vpop.permute.xlu1 %312 }
 0x152   : > { %v338_v44 = vmul.f32 %v1590_v25, %v313_v21 }
 0x153   : > { %vm476_vm0 = vcmp.ge.f32.partialorder %v459_v1, 0.0  ;;  %v496_v24 = vmul.f32 %v1610_v15, %v459_v1 }
 0x155   : > { %v512_v61 = vsel %vm476_vm0, %v459_v1, %v496_v24 }
 0x156   : > { %v399_v28 = vpop.permute.xlu1 %398  ;;  %v1081_v36 = vpack.c.bf16 %v512_v61, %v511_v19 }
 0x157   : > { %v423_v45 = vmul.f32 %v1595_v54, %v399_v28 }
 0x158   : > { %1083 = vmatpush3.bf16.xpose.msk.msra.mxu0 %vm1628_vm4, %v1081_v36 }
 0x159   : > { %v439_v20 = vadd.f32 %v423_v45, %v338_v44  ;;  %1084 = vmatprep.subr.bf16.mxu0 %v1252_v56  ;;  %v515_v56 = vld [vmem:[%s1760_s0 + $0x10] sm:$0xff] }
 0x15a   : > { %v403_v32 = vpop.permute.xlu1 %402 }
 0x15b   : > { %v460_v30 = vadd.f32 %v1604_v33, %v439_v20  ;;  %v424_v48 = vmul.f32 %v1595_v54, %v403_v32 }
 0x15d   : > { %v440_v49 = vadd.f32 %v424_v48, %v339_v47  ;;  %v497_v57 = vmul.f32 %v1610_v15, %v460_v30  ;;  %vm477_vm1 = vcmp.ge.f32.partialorder %v460_v30, 0.0 }
 0x15f   : > { %v461_v58 = vadd.f32 %v1604_v33, %v440_v49  ;;  %v513_v59 = vsel %vm477_vm1, %v460_v30, %v497_v57  ;;  %v886_v0 = vpop.permute.xlu1 %885 }
 0x161   : > { %vm478_vm3 = vcmp.ge.f32.partialorder %v461_v58, 0.0  ;;  %v498_v26 = vmul.f32 %v1610_v15, %v461_v58 }
 0x163   : > { %v514_v4 = vsel %vm478_vm3, %v461_v58, %v498_v26 }
 0x164   : > { %v1085_v25 = vpack.c.bf16 %v514_v4, %v513_v59 }
 0x166   : > { %1087 = vmatpush3.bf16.xpose.msk.msra.mxu0 %vm1628_vm4, %v1085_v25 }
 0x16d   : > { %1054 = vmatmul.mubr.msk.f32.vlgmr.msra.gmra.mrb[0].mxu0 %vm516_vm2, %v515_v56 }
 0x1fd   : > { %v873_v54 = vpop.f32.mrb[0].mxu1 }
 0x1fe   : > { %v875_v5 = vpop.f32.mrb[1].mxu1  ;;  %1184 = vrcp.f32 %v873_v54 }
 0x1ff   : > { %v876_v33 = vpop.f32.mrb[2].mxu1 }
 0x200   : > { %v877_v7 = vpop.f32.mrb[3].mxu1 }
 0x208   : > { %v1185_v31 = vpop.eup %1184 }
 0x209   : > { %v881_v15 = vrot.slane %v1185_v31, 1 }
 0x20b   : > { %v883_v29 = vmul.f32 %v881_v15, %v873_v54 }
 0x20d   : > { %v888_v42 = vadd.f32 %v886_v0, %v883_v29 }
 0x240   : > { %v634_v40 = vpop.f32.mrb[0].mxu0 }
 0x241   : > { %v642_v6 = vadd.f32 %v640_v41, %v634_v40  ;;  %v1055_v10 = vpop.f32.mrb[1].mxu0 }
 0x243   : > { %v889_v3 = vadd.f32 %v888_v42, %v642_v6 }
 0x245   : > { %890 = vst [vmem:[%s208_s10] sm:$0x1] %v889_v3 }
 0x246   : > { %1199 = shalt.err (!%p1196_p3)
}
 0x247   : > { %s1200_s27 = scalar_lea.hbm %s1718_s14, 16  ;;  %s1204_s5 = scalar_lea.hbm %s1764_s4, 32 }
 0x248   : > { %p1201_p4 = scmp.ne.s32.totalorder %s1718_s14, %s1200_s27  ;;  %p1205_p9 = scmp.lt.u32.totalorder %s1718_s14, %s1764_s4 }
 0x249   : > { %p1206_p10 = scmp.lt.u32.totalorder %s1204_s5, %s1200_s27  ;;  %p1208_p12 = scmp.lt.u32.totalorder %s1200_s27, %s1718_s14 }
 0x24a   : > { %p1202_p7 = pnand %p1201_p4, %p1318_p5 }
 0x24b   : > { %p1207_p11 = por %p1206_p10, %p1205_p9 }
 0x24c   : > { %p1203_p8 = pneg %p1202_p7 }
 0x24d   : > { %p1209_p13 = por %p1208_p12, %p1207_p11 }
 0x24f   : > { %p1210_p0 = pnand %p1209_p13, %p1203_p8 }
 0x251   : > { %1213 = shalt.err (!%p1210_p0)
}
 0x252   : > { %1090 = dma.vmem_to_hbm [thread:$0]  (%p1318_p5), %s1720_s11, 16, %s1718_s14, %s892_s19  }
 0x253 PF: > { %p1096_p1 = scmp.ge.s32.totalorder %s1248_s18, 2  ;;  %s916_s8 = sand.u32 1, %s1236_s15  }
 0x254   : > { %s917_s9 = scalar_lea.sflag [#allocation3], %s916_s8 }
 0x255   : > { %p1093_p2 = pnand %p1096_p1, %p1322_p6 }
 0x257   : > { %1231 = dma.done.wait (!%p1093_p2), %s917_s9, 16  }
 0x258   : > { %1233 = vsyncadd (!%p1093_p2), %s917_s9, 4294967280  ;;  %p14_p3 = scmp.ge.s32.totalorder %s1306_s21, 4   ;;  %s1769_s15 = smov %s1240_s16 }
 0x259   : > { %s1770_s16 = smov %s1244_s17  ;;  %s1771_s17 = smov %s1316_s24 }
 0x25a   : > { %s1772_s18 = smov %s1306_s21  ;;  %16 = sbr.rel (!%p14_p3) target bundleno = 3 (0x3), region = 74 }
 0x261   :  { %921 = vsyncpa [#allocation3], 1 }
 0x262   :  { %923 = vsyncpa [#allocation3 + $0x1], 1 }

// kernel: linear_body_forward.4
= control target key start
LH: loop header
LB: loop body
LE: loop exit
PB: predicated region body
PF: predicated region fallthrough
CT: control target
= control target key end

     0   :  { %s1120_s12 = smov 0   ;;  %s1513_s0 = inlined_call_operand.vmem [shape: f32[24,32], index: 0, kind: input, shape index: {}]   ;;  %s1514_s1 = inlined_call_operand.vmem [shape: f32[256,2], index: 1, kind: input, shape index: {}]   ;;  %s1515_s2 = inlined_call_operand.vmem [shape: f32[256,256], index: 2, kind: input, shape index: {}]   ;;  %s1516_s3 = inlined_call_operand.vmem [shape: f32[8,256], index: 3, kind: output, shape index: {}]  }
   0x1 LB: > { %s896_s13 = sadd.s32 4294967295, %s1091_s12   ;;  %p899_p0 = scmp.ge.s32.totalorder %s1091_s12, 1  ;;  %s1091_s12 = sphi %s1120_s12, %s13_s12  }
   0x2   : > { %p145_p1 = scmp.lt.s32.totalorder %s1091_s12, 3 }
   0x4   : > { %p146_p2 = pnand %p899_p0, %p145_p1 }
   0x5   : > { %s900_s14 = sshll.u32 (!%p146_p2), %s896_s13, 4  ;;  %p905_p4 = scmp.ne.s32.totalorder (!%p146_p2), %s896_s13, 0 }
   0x6   : > { %149 = sbr.rel (%p146_p2) target bundleno = 687 (0x2af), region = 32  ;;  %p171_p3 = scmp.lt.s32.totalorder (!%p146_p2), %s900_s14, 31 }
   0xd   : > { %s1520_s14 = smov (!%p171_p3, %s900_s14), 31  ;;  %187 = sbr.rel (%p905_p4) target bundleno = 20 (0x14), region = 36 }
   0xe   : > { %s901_s15 = sshll.u32 %s1520_s14, 3  ;;  %s928_s16 = sshll.u32 %s1520_s14, 4  ;;  %v1093_v0 = vmov (!%p905_p4), 0.0  }
   0xf   : > { %s1131_s19 = scalar_lea.vmem %s1514_s1, %s901_s15  ;;  %s1136_s22 = scalar_lea.vmem %s1515_s2, %s928_s16  ;;  %188 = vst [vmem:[%s1516_s3] sm:$0xff] (!%p905_p4), %v1093_v0  ;;  %189 = vst [vmem:[%s1516_s3 + $0x8] sm:$0xff] (!%p905_p4), %v1093_v0 }
  0x14 PF: > { %v190_v1 = vld [vmem:[%s1131_s19] sm:$0xff]  ;;  %v1094_v2 = vmov 1   ;;  %v1095_v3 = vmov 0   ;;  %v191_v4 = vld [vmem:[%s1131_s19 + $0x8] sm:$0xff]  ;;  %v192_v6 = vld [vmem:[%s1131_s19 + $0x10] sm:$0xff]  ;;  %v1096_v9 = vmov 0.0|0.0  }
  0x15   : > { %1033 = vset.pattern.permute.xlu1 %v1094_v2  ;;  %1032 = vset.pattern.permute.xlu0 %v1095_v3  ;;  %v1152_v5 = vld [vmem:[%s1513_s0 + $0x3] sm:$0x1]  ;;  %v193_v7 = vld [vmem:[%s1131_s19 + $0x18] sm:$0xff]  ;;  %v196_v8 = vld [vmem:[%s1131_s19 + $0x30] sm:$0xff]  ;;  %vm1097_vm0 = vmmov 0   ;;  %v1098_v31 = vmov 0.0  }
  0x16   : > { %309 = vperm.xlu1 %1033, %v190_v1   ;;  %209 = vperm.xlu0 %1032, %v190_v1   ;;  %1013 = vpush %v1152_v5  ;;  %v194_v10 = vld [vmem:[%s1131_s19 + $0x20] sm:$0xff]  ;;  %v195_v11 = vld [vmem:[%s1131_s19 + $0x28] sm:$0xff]  ;;  %v197_v13 = vld [vmem:[%s1131_s19 + $0x38] sm:$0xff]  ;;  %s1099_s29 = smov 127   ;;  %vm488_vm2 = vcmask 261120  }
  0x17   : > { %843 = vmatprep.mubr.bf16.mxu1 %v1095_v3  ;;  %981 = vmatprep.subr.bf16.mxu0 %v1096_v9  ;;  %v199_v12 = vld [vmem:[%s1131_s19 + $0x48] sm:$0xff]  ;;  %v200_v14 = vld [vmem:[%s1131_s19 + $0x50] sm:$0xff]  ;;  %v198_v15 = vld [vmem:[%s1131_s19 + $0x40] sm:$0xff] }
  0x18   : > { %v203_v16 = vld [vmem:[%s1131_s19 + $0x68] sm:$0xff]  ;;  %v204_v17 = vld [vmem:[%s1131_s19 + $0x70] sm:$0xff]  ;;  %v201_v18 = vld [vmem:[%s1131_s19 + $0x58] sm:$0xff]  ;;  %978 = vmatprep.mubr.msk.f32.mxu0 %vm1097_vm0, %v1098_v31 }
  0x19   : > { %v202_v19 = vld [vmem:[%s1131_s19 + $0x60] sm:$0xff]  ;;  %v205_v20 = vld [vmem:[%s1131_s19 + $0x78] sm:$0xff]  ;;  %v1188_v21 = vld [vmem:[%s1136_s22 + $0x10] sm:$0xff] }
  0x1a   : > { %313 = vperm.xlu1 %1033, %v191_v4   ;;  %214 = vperm.xlu0 %1032, %v191_v4   ;;  %v1191_v22 = vld [vmem:[%s1136_s22 + $0x18] sm:$0xff]  ;;  %v650_v23 = vmul.f32 %v1188_v21, %v1188_v21  ;;  %v1199_v26 = vld [vmem:[%s1136_s22 + $0x20] sm:$0xff]  ;;  %v1202_v27 = vld [vmem:[%s1136_s22 + $0x28] sm:$0xff] }
  0x1b   : > { %v651_v24 = vmul.f32 %v1191_v22, %v1191_v22  ;;  %v652_v28 = vmul.f32 %v1199_v26, %v1199_v26  ;;  %v653_v29 = vmul.f32 %v1202_v27, %v1202_v27  ;;  %v1212_v32 = vld [vmem:[%s1136_s22] sm:$0xff]  ;;  %v1215_v33 = vld [vmem:[%s1136_s22 + $0x8] sm:$0xff]  ;;  %v1222_v36 = vld [vmem:[%s1136_s22 + $0x30] sm:$0xff] }
  0x1c   : > { %v648_v34 = vmul.f32 %v1212_v32, %v1212_v32  ;;  %v649_v35 = vmul.f32 %v1215_v33, %v1215_v33  ;;  %v1225_v37 = vld [vmem:[%s1136_s22 + $0x38] sm:$0xff]  ;;  %v654_v39 = vmul.f32 %v1222_v36, %v1222_v36  ;;  %v1232_v41 = vld [vmem:[%s1136_s22 + $0x40] sm:$0xff]  ;;  %v1235_v42 = vld [vmem:[%s1136_s22 + $0x48] sm:$0xff] }
  0x1d   : > { %v683_v25 = vadd.f32 %v651_v24, %v650_v23  ;;  %v686_v30 = vadd.f32 %v653_v29, %v652_v28  ;;  %v655_v40 = vmul.f32 %v1225_v37, %v1225_v37  ;;  %v656_v44 = vmul.f32 %v1232_v41, %v1232_v41  ;;  %v1242_v46 = vld [vmem:[%s1136_s22 + $0x50] sm:$0xff]  ;;  %v1245_v47 = vld [vmem:[%s1136_s22 + $0x58] sm:$0xff]  ;;  %v1250_v48 = vld [vmem:[%s1513_s0 + $0x1] ss:$0 sm:$0xff] }
  0x1e   : > { %1034 = vset.pattern.permute.xlu1 %v1095_v3  ;;  %219 = vperm.xlu0 %1032, %v192_v6   ;;  %v680_v38 = vadd.f32 %v649_v35, %v648_v34  ;;  %v657_v45 = vmul.f32 %v1235_v42, %v1235_v42  ;;  %v1255_v49 = vld [vmem:[%s1513_s0] ss:$0 sm:$0xff]  ;;  %v658_v51 = vmul.f32 %v1242_v46, %v1242_v46  ;;  %v1265_v56 = vld [vmem:[%s1136_s22 + $0x68] sm:$0xff]  ;;  %v1272_v59 = vld [vmem:[%s1513_s0 + $0x2] ss:$0 sm:$0xff] }
  0x1f   : > { %224 = vperm.xlu1 %1034, %v193_v7   ;;  %v689_v43 = vadd.f32 %v655_v40, %v654_v39  ;;  %v659_v52 = vmul.f32 %v1245_v47, %v1245_v47  ;;  %v1262_v55 = vld [vmem:[%s1136_s22 + $0x60] sm:$0xff]  ;;  %v661_v63 = vmul.f32 %v1265_v56, %v1265_v56  ;;  %v1282_v1 = vld [vmem:[%s1136_s22 + $0xa8] sm:$0xff]  ;;  %v1285_v4 = vld [vmem:[%s1136_s22 + $0x70] sm:$0xff] }
  0x20   : > { %v692_v50 = vadd.f32 %v657_v45, %v656_v44  ;;  %v660_v62 = vmul.f32 %v1262_v55, %v1262_v55  ;;  %v1279_v0 = vld [vmem:[%s1136_s22 + $0xa0] sm:$0xff]  ;;  %v1317_v35 = vld [vmem:[%s1136_s22 + $0x90] sm:$0xff]  ;;  %v1321_v39 = vld [vmem:[%s1136_s22 + $0x98] sm:$0xff] }
  0x21   : > { %v695_v61 = vadd.f32 %v659_v52, %v658_v51  ;;  %vm1325_vm4 = vmpackc.low %vm488_vm2, %vm488_vm2 }
  0x22   : > { %1035 = vset.pattern.permute.xlu0 %v1094_v2 }
  0x23   : > { %1036 = vset.pattern.permute.xlu1 %v1094_v2  ;;  %317 = vperm.xlu0 %1035, %v192_v6  }
  0x24   : > { %321 = vperm.xlu1 %1036, %v193_v7  }
  0x27   : > { %333 = vperm.xlu0 %1035, %v196_v8  }
  0x28   : > { %1037 = vset.pattern.permute.xlu1 %v1095_v3 }
  0x29   : > { %229 = vperm.xlu1 %1037, %v194_v10  }
  0x2b   : > { %1040 = vset.pattern.permute.xlu0 %v1095_v3 }
  0x2c   : > { %234 = vperm.xlu0 %1040, %v195_v11  }
  0x2d   : > { %1038 = vset.pattern.permute.xlu1 %v1094_v2 }
  0x2e   : > { %325 = vperm.xlu1 %1038, %v194_v10  }
  0x30   : > { %239 = vperm.xlu0 %1040, %v196_v8  }
  0x32   : > { %329 = vperm.xlu1 %1038, %v195_v11   ;;  %v668_v11 = vmul.f32 %v1279_v0, %v1279_v0 }
  0x34   : > { %254 = vperm.xlu0 %1040, %v199_v12  }
  0x36   : > { %1039 = vset.pattern.permute.xlu1 %v1095_v3 }
  0x37   : > { %244 = vperm.xlu1 %1039, %v197_v13  }
  0x38   : > { %1045 = vset.pattern.permute.xlu0 %v1094_v2 }
  0x39   : > { %349 = vperm.xlu0 %1045, %v200_v14  }
  0x3b   : > { %1041 = vset.pattern.permute.xlu1 %v1094_v2 }
  0x3c   : > { %337 = vperm.xlu1 %1041, %v197_v13  }
  0x3d   : > { %1046 = vset.pattern.permute.xlu0 %v1095_v3 }
  0x3e   : > { %259 = vperm.xlu0 %1046, %v200_v14   ;;  %v698_v14 = vadd.f32 %v661_v63, %v660_v62  ;;  %v1339_v62 = vld [vmem:[%s1136_s22 + $0xb0] sm:$0xff]  ;;  %v1342_v63 = vld [vmem:[%s1136_s22 + $0xb8] sm:$0xff] }
  0x40   : > { %1042 = vset.pattern.permute.xlu1 %v1095_v3 }
  0x41   : > { %249 = vperm.xlu1 %1042, %v198_v15  }
  0x42   : > { %274 = vperm.xlu0 %1046, %v203_v16  }
  0x45   : > { %1043 = vset.pattern.permute.xlu1 %v1094_v2 }
  0x46   : > { %341 = vperm.xlu1 %1043, %v198_v15   ;;  %279 = vperm.xlu0 %1046, %v204_v17   ;;  %v662_v15 = vmul.f32 %v1285_v4, %v1285_v4 }
  0x47   : > { %s1014_s9 = spop %1013 }
  0x48   : > { %v1293_v10 = vstv %s1014_s9 }
  0x4a   : > { %345 = vperm.xlu1 %1043, %v199_v12   ;;  %1051 = vset.pattern.permute.xlu0 %v1094_v2  ;;  %v669_v12 = vmul.f32 %v1282_v1, %v1282_v1 }
  0x4b   : > { %365 = vperm.xlu0 %1051, %v204_v17   ;;  %v1304_v17 = vld [vmem:[%s1136_s22 + $0x80] sm:$0xff] }
  0x4c   : > { %v710_v28 = vadd.f32 %v669_v12, %v668_v11  ;;  %v670_v12 = vmul.f32 %v1339_v62, %v1339_v62 }
  0x4e   : > { %1044 = vset.pattern.permute.xlu1 %v1095_v3 }
  0x4f   : > { %264 = vperm.xlu1 %1044, %v201_v18  }
  0x53   : > { %1047 = vset.pattern.permute.xlu1 %v1094_v2 }
  0x54   : > { %353 = vperm.xlu1 %1047, %v201_v18  }
  0x58   : > { %1048 = vset.pattern.permute.xlu1 %v1095_v3 }
  0x59   : > { %269 = vperm.xlu1 %1048, %v202_v19  }
  0x5d   : > { %1049 = vset.pattern.permute.xlu1 %v1094_v2 }
  0x5e   : > { %357 = vperm.xlu1 %1049, %v202_v19   ;;  %v1307_v19 = vld [vmem:[%s1136_s22 + $0x88] sm:$0xff] }
  0x5f   : > { %v665_v34 = vmul.f32 %v1307_v19, %v1307_v19 }
  0x62   : > { %361 = vperm.xlu1 %1049, %v203_v16  }
  0x66   : > { %1050 = vset.pattern.permute.xlu1 %v1095_v3 }
  0x67   : > { %284 = vperm.xlu1 %1050, %v205_v20  }
  0x6a   : > { %684 = vadd.xlane.f32.xlu0 %v683_v25  ;;  %v664_v25 = vmul.f32 %v1304_v17, %v1304_v17 }
  0x6b   : > { %1052 = vset.pattern.permute.xlu1 %v1094_v2 }
  0x6c   : > { %369 = vperm.xlu1 %1052, %v205_v20  }
  0x6e   : > { %687 = vadd.xlane.f32.xlu0 %v686_v30 }
  0x84   : > { %483 = vrot.lane.b32.xlu0 %v1152_v5, %s1099_s29  ;;  %v1288_v5 = vld [vmem:[%s1136_s22 + $0x78] sm:$0xff] }
  0x85   : > { %v663_v16 = vmul.f32 %v1288_v5, %v1288_v5 }
  0x87   : > { %v701_v30 = vadd.f32 %v663_v16, %v662_v15  ;;  %v1355_v15 = vld [vmem:[%s1136_s22 + $0xc8] sm:$0xff] }
  0x90   : > { %681 = vadd.xlane.f32.xlu1 %v680_v38 }
  0x94   : > { %690 = vadd.xlane.f32.xlu1 %v689_v43 }
  0x95   : > { %v310_v53 = vpop.permute.xlu1 %309  ;;  %v210_v54 = vpop.permute.xlu0 %209 }
  0x96   : > { %v376_v57 = vmul.f32 %v1250_v48, %v310_v53  ;;  %v291_v58 = vmul.f32 %v1255_v49, %v210_v54  ;;  %v666_v53 = vmul.f32 %v1317_v35, %v1317_v35 }
  0x98   : > { %v392_v60 = vadd.f32 %v376_v57, %v291_v58  ;;  %693 = vadd.xlane.f32.xlu1 %v692_v50  ;;  %v704_v58 = vadd.f32 %v665_v34, %v664_v25 }
  0x99   : > { %v314_v2 = vpop.permute.xlu1 %313  ;;  %v215_v3 = vpop.permute.xlu0 %214 }
  0x9a   : > { %v413_v6 = vadd.f32 %v1272_v59, %v392_v60  ;;  %v377_v7 = vmul.f32 %v1250_v48, %v314_v2  ;;  %v292_v8 = vmul.f32 %v1255_v49, %v215_v3  ;;  %v667_v60 = vmul.f32 %v1321_v39, %v1321_v39 }
  0x9c   : > { %v393_v13 = vadd.f32 %v377_v7, %v292_v8  ;;  %696 = vadd.xlane.f32.xlu1 %v695_v61  ;;  %v450_v24 = vmul.f32 %v1293_v10, %v413_v6  ;;  %vm430_vm1 = vcmp.ge.f32.partialorder %v413_v6, 0.0  ;;  %v707_v11 = vadd.f32 %v667_v60, %v666_v53 }
  0x9d   : > { %v220_v18 = vpop.permute.xlu0 %219 }
  0x9e   : > { %v414_v20 = vadd.f32 %v1272_v59, %v393_v13  ;;  %v225_v23 = vpop.permute.xlu1 %224  ;;  %v293_v38 = vmul.f32 %v1255_v49, %v220_v18  ;;  %v466_v43 = vsel %vm430_vm1, %v413_v6, %v450_v24  ;;  %v671_v13 = vmul.f32 %v1342_v63, %v1342_v63 }
  0x9f   : > { %v294_v54 = vmul.f32 %v1255_v49, %v225_v23  ;;  %v673_v24 = vmul.f32 %v1355_v15, %v1355_v15 }
  0xa0   : > { %vm431_vm3 = vcmp.ge.f32.partialorder %v414_v20, 0.0  ;;  %v451_v29 = vmul.f32 %v1293_v10, %v414_v20  ;;  %699 = vadd.xlane.f32.xlu1 %v698_v14  ;;  %v1352_v14 = vld [vmem:[%s1136_s22 + $0xc0] sm:$0xff] }
  0xa1   : > { %v672_v23 = vmul.f32 %v1352_v14, %v1352_v14 }
  0xa2   : > { %v318_v40 = vpop.permute.xlu0 %317  ;;  %v467_v44 = vsel %vm431_vm3, %v414_v20, %v451_v29  ;;  %v1364_v29 = vld [vmem:[%s1136_s22 + $0xd0] sm:$0xff] }
  0xa3   : > { %v322_v50 = vpop.permute.xlu1 %321  ;;  %v378_v51 = vmul.f32 %v1250_v48, %v318_v40  ;;  %v982_v52 = vpack.c.bf16 %v467_v44, %v466_v43  ;;  %711 = vadd.xlane.f32.xlu0 %v710_v28  ;;  %v713_v28 = vadd.f32 %v671_v13, %v670_v12  ;;  %v1367_v40 = vld [vmem:[%s1136_s22 + $0xd8] sm:$0xff] }
  0xa4   : > { %v379_v57 = vmul.f32 %v1250_v48, %v322_v50  ;;  %702 = vadd.xlane.f32.xlu1 %v701_v30  ;;  %v716_v50 = vadd.f32 %v673_v24, %v672_v23 }
  0xa5   : > { %v394_v61 = vadd.f32 %v378_v51, %v293_v38  ;;  %984 = vmatpush3.bf16.xpose.msk.msra.mxu0 %vm1325_vm4, %v982_v52  ;;  %v674_v51 = vmul.f32 %v1364_v29, %v1364_v29 }
  0xa6   : > { %v395_v2 = vadd.f32 %v379_v57, %v294_v54  ;;  %985 = vmatprep.subr.bf16.mxu0 %v1096_v9  ;;  %v334_v6 = vpop.permute.xlu0 %333  ;;  %v675_v54 = vmul.f32 %v1367_v40, %v1367_v40  ;;  %v1380_v57 = vld [vmem:[%s1136_s22 + $0xe0] sm:$0xff] }
  0xa7   : > { %v415_v3 = vadd.f32 %v1272_v59, %v394_v61 }
  0xa8   : > { %v416_v7 = vadd.f32 %v1272_v59, %v395_v2  ;;  %v230_v8 = vpop.permute.xlu1 %229  ;;  %705 = vadd.xlane.f32.xlu1 %v704_v58  ;;  %v1383_v58 = vld [vmem:[%s1136_s22 + $0xe8] sm:$0xff] }
  0xa9   : > { %vm432_vm5 = vcmp.ge.f32.partialorder %v415_v3, 0.0  ;;  %v452_v16 = vmul.f32 %v1293_v10, %v415_v3  ;;  %v295_v43 = vmul.f32 %v1255_v49, %v230_v8  ;;  %v677_v8 = vmul.f32 %v1383_v58, %v1383_v58 }
  0xaa   : > { %vm433_vm6 = vcmp.ge.f32.partialorder %v416_v7, 0.0  ;;  %v453_v18 = vmul.f32 %v1293_v10, %v416_v7 }
  0xab   : > { %v468_v20 = vsel %vm432_vm5, %v415_v3, %v452_v16  ;;  %v235_v34 = vpop.permute.xlu0 %234  ;;  %v719_v16 = vadd.f32 %v675_v54, %v674_v51 }
  0xac   : > { %v469_v25 = vsel %vm433_vm6, %v416_v7, %v453_v18  ;;  %708 = vadd.xlane.f32.xlu1 %v707_v11  ;;  %v296_v53 = vmul.f32 %v1255_v49, %v235_v34  ;;  %v676_v7 = vmul.f32 %v1380_v57, %v1380_v57  ;;  %v382_v11 = vmul.f32 %v1250_v48, %v334_v6  ;;  %v1394_v18 = vld [vmem:[%s1136_s22 + $0xf0] sm:$0xff] }
  0xad   : > { %v326_v30 = vpop.permute.xlu1 %325  ;;  %v986_v38 = vpack.c.bf16 %v469_v25, %v468_v20  ;;  %v1397_v20 = vld [vmem:[%s1136_s22 + $0xf8] sm:$0xff] }
  0xae   : > { %v380_v44 = vmul.f32 %v1250_v48, %v326_v30  ;;  %v679_v6 = vmul.f32 %v1397_v20, %v1397_v20 }
  0xaf   : > { %988 = vmatpush3.bf16.xpose.msk.msra.mxu0 %vm1325_vm4, %v986_v38  ;;  %v240_v3 = vpop.permute.xlu0 %239  ;;  %v722_v38 = vadd.f32 %v677_v8, %v676_v7 }
  0xb0   : > { %v396_v52 = vadd.f32 %v380_v44, %v295_v43  ;;  %989 = vmatprep.subr.bf16.mxu0 %v1096_v9  ;;  %714 = vadd.xlane.f32.xlu1 %v713_v28  ;;  %v297_v13 = vmul.f32 %v1255_v49, %v240_v3  ;;  %v678_v28 = vmul.f32 %v1394_v18, %v1394_v18 }
  0xb1   : > { %v330_v60 = vpop.permute.xlu1 %329 }
  0xb2   : > { %v417_v61 = vadd.f32 %v1272_v59, %v396_v52  ;;  %v381_v2 = vmul.f32 %v1250_v48, %v330_v60  ;;  %v398_v34 = vadd.f32 %v382_v11, %v297_v13  ;;  %v725_v60 = vadd.f32 %v679_v6, %v678_v28 }
  0xb4   : > { %v397_v12 = vadd.f32 %v381_v2, %v296_v53  ;;  %717 = vadd.xlane.f32.xlu1 %v716_v50  ;;  %v454_v23 = vmul.f32 %v1293_v10, %v417_v61  ;;  %vm434_vm7 = vcmp.ge.f32.partialorder %v417_v61, 0.0  ;;  %v419_v52 = vadd.f32 %v1272_v59, %v398_v34  ;;  %v255_v2 = vpop.permute.xlu0 %254 }
  0xb6   : > { %v418_v24 = vadd.f32 %v1272_v59, %v397_v12  ;;  %v245_v25 = vpop.permute.xlu1 %244  ;;  %v470_v43 = vsel %vm434_vm7, %v417_v61, %v454_v23  ;;  %v456_v61 = vmul.f32 %v1293_v10, %v419_v52  ;;  %vm436_vm9 = vcmp.ge.f32.partialorder %v419_v52, 0.0 }
  0xb7   : > { %v298_v53 = vmul.f32 %v1255_v49, %v245_v25 }
  0xb8   : > { %vm435_vm8 = vcmp.ge.f32.partialorder %v418_v24, 0.0  ;;  %v455_v30 = vmul.f32 %v1293_v10, %v418_v24  ;;  %720 = vadd.xlane.f32.xlu1 %v719_v16  ;;  %v350_v12 = vpop.permute.xlu0 %349  ;;  %v472_v13 = vsel %vm436_vm9, %v419_v52, %v456_v61 }
  0xba   : > { %v471_v44 = vsel %vm435_vm8, %v418_v24, %v455_v30 }
  0xbb   : > { %v338_v50 = vpop.permute.xlu1 %337  ;;  %v990_v51 = vpack.c.bf16 %v471_v44, %v470_v43 }
  0xbc   : > { %v383_v54 = vmul.f32 %v1250_v48, %v338_v50  ;;  %723 = vadd.xlane.f32.xlu1 %v722_v38  ;;  %v300_v38 = vmul.f32 %v1255_v49, %v255_v2  ;;  %v386_v50 = vmul.f32 %v1250_v48, %v350_v12 }
  0xbd   : > { %992 = vmatpush3.bf16.xpose.msk.msra.mxu0 %vm1325_vm4, %v990_v51  ;;  %v260_v30 = vpop.permute.xlu0 %259 }
  0xbe   : > { %v399_v3 = vadd.f32 %v383_v54, %v298_v53  ;;  %993 = vmatprep.subr.bf16.mxu0 %v1096_v9  ;;  %v301_v51 = vmul.f32 %v1255_v49, %v260_v30 }
  0xc0   : > { %v420_v7 = vadd.f32 %v1272_v59, %v399_v3  ;;  %v250_v8 = vpop.permute.xlu1 %249  ;;  %726 = vadd.xlane.f32.xlu1 %v725_v60  ;;  %v402_v3 = vadd.f32 %v386_v50, %v301_v51 }
  0xc1   : > { %v299_v25 = vmul.f32 %v1255_v49, %v250_v8 }
  0xc2   : > { %vm437_vm10 = vcmp.ge.f32.partialorder %v420_v7, 0.0  ;;  %v457_v11 = vmul.f32 %v1293_v10, %v420_v7 }
  0xc4   : > { %v473_v16 = vsel %vm437_vm10, %v420_v7, %v457_v11 }
  0xc5   : > { %v342_v23 = vpop.permute.xlu1 %341  ;;  %v994_v24 = vpack.c.bf16 %v473_v16, %v472_v13  ;;  %v423_v13 = vadd.f32 %v1272_v59, %v402_v3 }
  0xc6   : > { %v384_v28 = vmul.f32 %v1250_v48, %v342_v23  ;;  %v275_v23 = vpop.permute.xlu0 %274 }
  0xc7   : > { %996 = vmatpush3.bf16.xpose.msk.msra.mxu0 %vm1325_vm4, %v994_v24  ;;  %vm440_vm13 = vcmp.ge.f32.partialorder %v423_v13, 0.0  ;;  %v304_v3 = vmul.f32 %v1255_v49, %v275_v23 }
  0xc8   : > { %v400_v6 = vadd.f32 %v384_v28, %v299_v25  ;;  %997 = vmatprep.subr.bf16.mxu0 %v1096_v9  ;;  %v460_v25 = vmul.f32 %v1293_v10, %v423_v13 }
  0xc9   : > { %v346_v34 = vpop.permute.xlu1 %345 }
  0xca   : > { %v421_v43 = vadd.f32 %v1272_v59, %v400_v6  ;;  %v385_v44 = vmul.f32 %v1250_v48, %v346_v34  ;;  %v280_v34 = vpop.permute.xlu0 %279 }
  0xcc   : > { %v401_v52 = vadd.f32 %v385_v44, %v300_v38  ;;  %v458_v53 = vmul.f32 %v1293_v10, %v421_v43  ;;  %vm438_vm11 = vcmp.ge.f32.partialorder %v421_v43, 0.0  ;;  %v476_v38 = vsel %vm440_vm13, %v423_v13, %v460_v25 }
  0xce   : > { %v422_v54 = vadd.f32 %v1272_v59, %v401_v52  ;;  %v265_v60 = vpop.permute.xlu1 %264  ;;  %v474_v2 = vsel %vm438_vm11, %v421_v43, %v458_v53 }
  0xcf   : > { %v302_v12 = vmul.f32 %v1255_v49, %v265_v60 }
  0xd0   : > { %vm439_vm12 = vcmp.ge.f32.partialorder %v422_v54, 0.0  ;;  %v459_v61 = vmul.f32 %v1293_v10, %v422_v54 }
  0xd2   : > { %v475_v7 = vsel %vm439_vm12, %v422_v54, %v459_v61  ;;  %v366_v54 = vpop.permute.xlu0 %365 }
  0xd3   : > { %v354_v8 = vpop.permute.xlu1 %353  ;;  %v998_v11 = vpack.c.bf16 %v475_v7, %v474_v2  ;;  %v305_v7 = vmul.f32 %v1255_v49, %v280_v34 }
  0xd4   : > { %v387_v16 = vmul.f32 %v1250_v48, %v354_v8  ;;  %v390_v8 = vmul.f32 %v1250_v48, %v366_v54 }
  0xd5   : > { %1000 = vmatpush3.bf16.xpose.msk.msra.mxu0 %vm1325_vm4, %v998_v11 }
  0xd6   : > { %v403_v24 = vadd.f32 %v387_v16, %v302_v12  ;;  %1001 = vmatprep.subr.bf16.mxu0 %v1096_v9 }
  0xd8   : > { %v424_v28 = vadd.f32 %v1272_v59, %v403_v24  ;;  %v270_v6 = vpop.permute.xlu1 %269  ;;  %v406_v24 = vadd.f32 %v390_v8, %v305_v7 }
  0xd9   : > { %v303_v51 = vmul.f32 %v1255_v49, %v270_v6 }
  0xda   : > { %vm441_vm14 = vcmp.ge.f32.partialorder %v424_v28, 0.0  ;;  %v461_v30 = vmul.f32 %v1293_v10, %v424_v28 }
  0xdc   : > { %v477_v43 = vsel %vm441_vm14, %v424_v28, %v461_v30 }
  0xdd   : > { %v358_v44 = vpop.permute.xlu1 %357  ;;  %v1002_v50 = vpack.c.bf16 %v477_v43, %v476_v38  ;;  %v427_v38 = vadd.f32 %v1272_v59, %v406_v24 }
  0xde   : > { %v388_v52 = vmul.f32 %v1250_v48, %v358_v44 }
  0xdf   : > { %1004 = vmatpush3.bf16.xpose.msk.msra.mxu0 %vm1325_vm4, %v1002_v50  ;;  %v464_v50 = vmul.f32 %v1293_v10, %v427_v38  ;;  %vm444_vm1 = vcmp.ge.f32.partialorder %v427_v38, 0.0 }
  0xe0   : > { %v404_v53 = vadd.f32 %v388_v52, %v303_v51  ;;  %1005 = vmatprep.subr.bf16.mxu0 %v1096_v9 }
  0xe1   : > { %v362_v60 = vpop.permute.xlu1 %361 }
  0xe2   : > { %v425_v61 = vadd.f32 %v1272_v59, %v404_v53  ;;  %v389_v2 = vmul.f32 %v1250_v48, %v362_v60  ;;  %v480_v53 = vsel %vm444_vm1, %v427_v38, %v464_v50 }
  0xe4   : > { %v405_v11 = vadd.f32 %v389_v2, %v304_v3  ;;  %v462_v13 = vmul.f32 %v1293_v10, %v425_v61  ;;  %vm442_vm15 = vcmp.ge.f32.partialorder %v425_v61, 0.0 }
  0xe6   : > { %v426_v12 = vadd.f32 %v1272_v59, %v405_v11  ;;  %v285_v16 = vpop.permute.xlu1 %284  ;;  %v478_v23 = vsel %vm442_vm15, %v425_v61, %v462_v13 }
  0xe7   : > { %v306_v34 = vmul.f32 %v1255_v49, %v285_v16  ;;  %v482_v49 = vld [vmem:[%s1513_s0 + $0x8] sm:$0xff] }
  0xe8   : > { %vm443_vm0 = vcmp.ge.f32.partialorder %v426_v12, 0.0  ;;  %v463_v25 = vmul.f32 %v1293_v10, %v426_v12 }
  0xea   : > { %v479_v28 = vsel %vm443_vm0, %v426_v12, %v463_v25 }
  0xeb   : > { %v370_v6 = vpop.permute.xlu1 %369  ;;  %v1006_v30 = vpack.c.bf16 %v479_v28, %v478_v23 }
  0xec   : > { %v391_v43 = vmul.f32 %v1250_v48, %v370_v6 }
  0xed   : > { %1008 = vmatpush3.bf16.xpose.msk.msra.mxu0 %vm1325_vm4, %v1006_v30 }
  0xee   : > { %v407_v44 = vadd.f32 %v391_v43, %v306_v34  ;;  %1009 = vmatprep.subr.bf16.mxu0 %v1096_v9 }
  0xf0   : > { %v428_v51 = vadd.f32 %v1272_v59, %v407_v44 }
  0xf2   : > { %vm445_vm3 = vcmp.ge.f32.partialorder %v428_v51, 0.0  ;;  %v465_v52 = vmul.f32 %v1293_v10, %v428_v51 }
  0xf4   : > { %v481_v54 = vsel %vm445_vm3, %v428_v51, %v465_v52 }
  0xf5   : > { %v1010_v60 = vpack.c.bf16 %v481_v54, %v480_v53 }
  0xf7   : > { %1012 = vmatpush3.bf16.xpose.msk.msra.mxu0 %vm1325_vm4, %v1010_v60  ;;  %v685_v48 = vpop.xlane.xlu0 %684 }
  0xf8   : > { %v729_v59 = vadd.f32 1e-08, %v685_v48 }
  0xfa   : > { %1053 = vrsqrt.f32 %v729_v59 }
  0xfb   : > { %v688_v9 = vpop.xlane.xlu0 %687 }
  0xfc   : > { %v730_v61 = vadd.f32 1e-08, %v688_v9 }
  0xfe   : > { %979 = vmatmul.mubr.msk.f32.vlgmr.msra.gmra.mrb[0].mxu0 %vm488_vm2, %v482_v49  ;;  %1055 = vrsqrt.f32 %v730_v61 }
  0xff   : > { %v484_v3 = vpop.permute.xlu0 %483 }
 0x100   : > { %1015 = vpush %v484_v3 }
 0x104   : > { %v1054_v11 = vpop.eup %1053 }
 0x105   : > { %v763_v16 = vmul.f32 %v1054_v11, %v1191_v22  ;;  %v762_v24 = vmul.f32 %v1054_v11, %v1188_v21 }
 0x108   : > { %v1056_v12 = vpop.eup %1055 }
 0x109   : > { %v765_v43 = vmul.f32 %v1056_v12, %v1202_v27  ;;  %v764_v44 = vmul.f32 %v1056_v12, %v1199_v26 }
 0x11d   : > { %v682_v10 = vpop.xlane.xlu1 %681 }
 0x11e   : > { %v728_v2 = vadd.f32 1e-08, %v682_v10 }
 0x120   : > { %1057 = vrsqrt.f32 %v728_v2 }
 0x121   : > { %v691_v7 = vpop.xlane.xlu1 %690 }
 0x122   : > { %v731_v45 = vadd.f32 1e-08, %v691_v7 }
 0x124   : > { %1059 = vrsqrt.f32 %v731_v45 }
 0x125   : > { %v694_v8 = vpop.xlane.xlu1 %693 }
 0x126   : > { %v732_v13 = vadd.f32 1e-08, %v694_v8 }
 0x128   : > { %1061 = vrsqrt.f32 %v732_v13 }
 0x129   : > { %v697_v25 = vpop.xlane.xlu1 %696 }
 0x12a   : > { %v1058_v23 = vpop.eup %1057  ;;  %v733_v28 = vadd.f32 1e-08, %v697_v25 }
 0x12b   : > { %v761_v6 = vmul.f32 %v1058_v23, %v1215_v33  ;;  %v760_v30 = vmul.f32 %v1058_v23, %v1212_v32 }
 0x12c   : > { %1063 = vrsqrt.f32 %v733_v28 }
 0x12d   : > { %v796_v38 = vpack.c.bf16 %v763_v16, %v761_v6  ;;  %v795_v34 = vpack.c.bf16 %v762_v24, %v760_v30  ;;  %v700_v50 = vpop.xlane.xlu1 %699 }
 0x12e   : > { %v1060_v51 = vpop.eup %1059  ;;  %v734_v52 = vadd.f32 1e-08, %v700_v50 }
 0x12f   : > { %811 = vmatprep.subr.bf16.mxu1 %v796_v38  ;;  %v767_v21 = vmul.f32 %v1060_v51, %v1225_v37  ;;  %v766_v22 = vmul.f32 %v1060_v51, %v1222_v36 }
 0x130   : > { %812 = vmatpush1.bf16.msra.mxu1 %v795_v34  ;;  %1065 = vrsqrt.f32 %v734_v52  ;;  %v712_v27 = vpop.xlane.xlu0 %711 }
 0x131   : > { %v798_v33 = vpack.c.bf16 %v767_v21, %v765_v43  ;;  %v797_v53 = vpack.c.bf16 %v766_v22, %v764_v44  ;;  %v703_v32 = vpop.xlane.xlu1 %702  ;;  %v738_v59 = vadd.f32 1e-08, %v712_v27  ;;  %s1016_s13 = spop %1015 }
 0x132   : > { %v1062_v54 = vpop.eup %1061  ;;  %v735_v60 = vadd.f32 1e-08, %v703_v32 }
 0x133   : > { %813 = vmatprep.subr.bf16.mxu1 %v798_v33  ;;  %v769_v48 = vmul.f32 %v1062_v54, %v1235_v42  ;;  %v768_v49 = vmul.f32 %v1062_v54, %v1232_v41 }
 0x134   : > { %814 = vmatpush1.bf16.msra.mxu1 %v797_v53  ;;  %1067 = vrsqrt.f32 %v735_v60 }
 0x135   : > { %v706_v26 = vpop.xlane.xlu1 %705 }
 0x136   : > { %v1064_v9 = vpop.eup %1063  ;;  %v736_v37 = vadd.f32 1e-08, %v706_v26 }
 0x137   : > { %v771_v36 = vmul.f32 %v1064_v9, %v1245_v47  ;;  %v770_v3 = vmul.f32 %v1064_v9, %v1242_v46 }
 0x138   : > { %1069 = vrsqrt.f32 %v736_v37 }
 0x139   : > { %v709_v61 = vpop.xlane.xlu1 %708  ;;  %v800_v10 = vpack.c.bf16 %v771_v36, %v769_v48  ;;  %v799_v2 = vpack.c.bf16 %v770_v3, %v768_v49  ;;  %1071 = vrsqrt.f32 %v738_v59  ;;  %v486_v3 = vstv %s1016_s13 }
 0x13a   : > { %v1066_v7 = vpop.eup %1065  ;;  %v737_v45 = vadd.f32 1e-08, %v709_v61 }
 0x13b   : > { %815 = vmatprep.subr.bf16.mxu1 %v800_v10  ;;  %v773_v41 = vmul.f32 %v1066_v7, %v1265_v56  ;;  %v772_v8 = vmul.f32 %v1066_v7, %v1262_v55 }
 0x13c   : > { %1073 = vrsqrt.f32 %v737_v45  ;;  %816 = vmatpush1.bf16.msra.mxu1 %v799_v2 }
 0x13d   : > { %v715_v42 = vpop.xlane.xlu1 %714 }
 0x13e   : > { %v1068_v11 = vpop.eup %1067  ;;  %v739_v47 = vadd.f32 1e-08, %v715_v42 }
 0x13f   : > { %v775_v46 = vmul.f32 %v1068_v11, %v1288_v5  ;;  %v774_v13 = vmul.f32 %v1068_v11, %v1285_v4 }
 0x140   : > { %1075 = vrsqrt.f32 %v739_v47 }
 0x141   : > { %v718_v12 = vpop.xlane.xlu1 %717  ;;  %v802_v16 = vpack.c.bf16 %v775_v46, %v773_v41  ;;  %v801_v24 = vpack.c.bf16 %v774_v13, %v772_v8 }
 0x142   : > { %v1070_v25 = vpop.eup %1069  ;;  %v740_v23 = vadd.f32 1e-08, %v718_v12 }
 0x143   : > { %817 = vmatprep.subr.bf16.mxu1 %v802_v16  ;;  %v1072_v28 = vpop.eup %1071  ;;  %v777_v56 = vmul.f32 %v1070_v25, %v1307_v19  ;;  %v776_v55 = vmul.f32 %v1070_v25, %v1304_v17 }
 0x144   : > { %1077 = vrsqrt.f32 %v740_v23  ;;  %818 = vmatpush1.bf16.msra.mxu1 %v801_v24  ;;  %v781_v50 = vmul.f32 %v1072_v28, %v1282_v1  ;;  %v780_v51 = vmul.f32 %v1072_v28, %v1279_v0 }
 0x145   : > { %v721_v6 = vpop.xlane.xlu1 %720 }
 0x146   : > { %v1074_v30 = vpop.eup %1073  ;;  %v741_v38 = vadd.f32 1e-08, %v721_v6 }
 0x147   : > { %v779_v5 = vmul.f32 %v1074_v30, %v1321_v39  ;;  %v778_v4 = vmul.f32 %v1074_v30, %v1317_v35 }
 0x148   : > { %1079 = vrsqrt.f32 %v741_v38 }
 0x149   : > { %v724_v34 = vpop.xlane.xlu1 %723  ;;  %v804_v43 = vpack.c.bf16 %v779_v5, %v777_v56  ;;  %v803_v44 = vpack.c.bf16 %v778_v4, %v776_v55 }
 0x14a   : > { %v1076_v52 = vpop.eup %1075  ;;  %v742_v21 = vadd.f32 1e-08, %v724_v34 }
 0x14b   : > { %819 = vmatprep.subr.bf16.mxu1 %v804_v43  ;;  %v783_v19 = vmul.f32 %v1076_v52, %v1342_v63  ;;  %v782_v17 = vmul.f32 %v1076_v52, %v1339_v62 }
 0x14c   : > { %1081 = vrsqrt.f32 %v742_v21  ;;  %820 = vmatpush1.bf16.msra.mxu1 %v803_v44 }
 0x14d   : > { %v727_v39 = vpop.xlane.xlu1 %726  ;;  %v806_v22 = vpack.c.bf16 %v783_v19, %v781_v50  ;;  %v805_v35 = vpack.c.bf16 %v782_v17, %v780_v51 }
 0x14e   : > { %v1078_v33 = vpop.eup %1077  ;;  %v743_v53 = vadd.f32 1e-08, %v727_v39 }
 0x14f   : > { %821 = vmatprep.subr.bf16.mxu1 %v806_v22  ;;  %v785_v1 = vmul.f32 %v1078_v33, %v1355_v15  ;;  %v784_v0 = vmul.f32 %v1078_v33, %v1352_v14 }
 0x150   : > { %1083 = vrsqrt.f32 %v743_v53  ;;  %822 = vmatpush1.bf16.msra.mxu1 %v805_v35 }
 0x152   : > { %v1080_v32 = vpop.eup %1079 }
 0x153   : > { %v787_v54 = vmul.f32 %v1080_v32, %v1367_v40  ;;  %v786_v63 = vmul.f32 %v1080_v32, %v1364_v29  ;;  %v610_v40 = vlaneseq }
 0x155   : > { %v808_v62 = vpack.c.bf16 %v787_v54, %v785_v1  ;;  %v807_v60 = vpack.c.bf16 %v786_v63, %v784_v0  ;;  %v611_v29 = vshrl.u32 %v610_v40, 7 }
 0x156   : > { %v1082_v27 = vpop.eup %1081 }
 0x157   : > { %823 = vmatprep.subr.bf16.mxu1 %v808_v62  ;;  %v789_v26 = vmul.f32 %v1082_v27, %v1383_v58  ;;  %v788_v48 = vmul.f32 %v1082_v27, %v1380_v57  ;;  %vm613_vm2 = vcmp.eq.s32.totalorder %v611_v29, 1  ;;  %vm612_vm4 = vcmp.eq.s32.totalorder %v611_v29, 0 }
 0x158   : > { %824 = vmatpush1.bf16.msra.mxu1 %v807_v60  ;;  %v614_v36 = vsel %vm613_vm2, 1.0, %v1098_v31 }
 0x15a   : > { %v1084_v49 = vpop.eup %1083 }
 0x15b   : > { %v791_v9 = vmul.f32 %v1084_v49, %v1397_v20  ;;  %v790_v15 = vmul.f32 %v1084_v49, %v1394_v18  ;;  %v792_v18 = vld [vmem:[%s1516_s3] sm:$0xff]  ;;  %v793_v20 = vld [vmem:[%s1516_s3 + $0x8] sm:$0xff] }
 0x15d   : > { %v810_v14 = vpack.c.bf16 %v791_v9, %v789_v26  ;;  %v809_v37 = vpack.c.bf16 %v790_v15, %v788_v48 }
 0x15f   : > { %825 = vmatprep.subr.bf16.mxu1 %v810_v14 }
 0x160   : > { %826 = vmatpush1.bf16.msra.mxu1 %v809_v37 }
 0x1d1   : > { %v606_v59 = vpop.f32.mrb[0].mxu0 }
 0x1d2   : > { %v607_v58 = vadd.f32 %v606_v59, %v486_v3  ;;  %v980_v57 = vpop.f32.mrb[1].mxu0 }
 0x1d4   : > { %v615_v61 = vsel %vm612_vm4, %v607_v58, %v614_v36 }
 0x1d5   : > { %v794_v10 = vpack.c.bf16 %v615_v61, %v615_v61 }
 0x1d7   : > { %844 = vmatmul.mubr.bf16.vlgmr.msra.gmra.mrb[0].mxu1 %v794_v10 }
 0x2aa   : > { %v845_v2 = vpop.f32.mrb[0].mxu1 }
 0x2ab   : > { %v852_v7 = vadd.f32 %v845_v2, %v792_v18  ;;  %v847_v45 = vpop.f32.mrb[1].mxu1 }
 0x2ac   : > { %v853_v31 = vadd.f32 %v847_v45, %v793_v20  ;;  %v849_v42 = vpop.f32.mrb[2].mxu1 }
 0x2ad   : > { %854 = vst [vmem:[%s1516_s3] sm:$0xff] %v852_v7  ;;  %v850_v41 = vpop.f32.mrb[3].mxu1 }
 0x2ae   : > { %855 = vst [vmem:[%s1516_s3 + $0x8] sm:$0xff] %v853_v31 }
 0x2af PF: > { %s13_s12 = sadd.s32 1, %s1091_s12  }
 0x2b0   : > { %p10_p5 = scmp.ge.s32.totalorder %s13_s12, 4  }
 0x2b2   :  { %12 = sbr.rel (!%p10_p5) target bundleno = 1 (0x1), region = 65 }

</bundles_post_ra>
